<compile_context>
chip_gen: v5e
topology: v5e:2x2
jax: 0.10.0
libtpu: 0.0.40
codegen_flags: <defaults>
</compile_context>

<pallas_src>
import functools

import jax
import jax.numpy as jnp
from jax import lax
from jax.experimental import pallas as pl
from jax.experimental.pallas import tpu as pltpu

NEG_INF = -(2.0 ** 32) + 1.0  # same padding constant the reference SASRec modules use


def _round_up(x, m):
    return ((x + m - 1) // m) * m


def _choose_block_b(B, L, D, H):
    """Pick a batch block: fill the MXU M dim, stay VMEM-friendly, multiple of 8."""
    want = max(8, -(-256 // L))                       # aim for Bt*L >= 256
    per_b_bytes = 4 * (10 * L * D + 3 * H * L * L)    # rough per-batch-row footprint
    cap_vmem = max(8, (8 * 1024 * 1024) // max(per_b_bytes, 1))
    bt = min(want, cap_vmem, _round_up(B, 8))
    return max(8, (bt // 8) * 8)


def _layer_norm(x, g, b, eps=1e-5):
    mu = jnp.mean(x, axis=-1, keepdims=True)
    var = jnp.mean((x - mu) ** 2, axis=-1, keepdims=True)
    return (x - mu) * lax.rsqrt(var + eps) * g + b


def _sasrec_kernel(
    x_ref,        # (Bt, L, D) item embeddings for this batch block
    mask_ref,     # (Bt, L, 1) padding mask (1.0 = real item, 0.0 = pad)
    mask_t_ref,   # (Bt, 1, L) same mask, key-axis layout (built in the wrapper)
    pos_ref,      # (L, D) positional embeddings
    ln1_g, ln1_b,
    wq_ref, bq_ref,
    wkv_ref, bkv_ref,          # fused K/V projection: (D, 2D), (1, 2D)
    ln2_g, ln2_b,
    w1_ref, b1_ref, w2_ref, b2_ref,
    ln3_g, ln3_b,
    out_ref,      # (Bt, D) last-position hidden states
    *, num_heads,
):
    Bt, L, D = x_ref.shape
    H = num_heads
    dh = D // H
    M = Bt * L

    mask = mask_ref[...]                                      # (Bt, L, 1)
    # inputs_emb += positional_embeddings ; emb_dropout is identity (eval) ; seq *= mask
    seq = (x_ref[...] + pos_ref[...][None, :, :]) * mask      # (Bt, L, D)
    seq_norm = _layer_norm(seq, ln1_g[...], ln1_b[...])       # ln_1(seq)

    # ---- MultiHeadAttention(queries=seq_norm, keys=seq) ----
    # projections on a flattened (Bt*L, D) slab to fill the MXU M dimension
    seq_flat = seq.reshape(M, D)
    seqn_flat = seq_norm.reshape(M, D)
    scale = 1.0 / jnp.sqrt(jnp.float32(D))        # reference scales by sqrt(hidden_dim)

    q = (jnp.dot(seqn_flat, wq_ref[...], preferred_element_type=jnp.float32)
         + bq_ref[...]) * scale                               # scale folded into Q
    kv = (jnp.dot(seq_flat, wkv_ref[...], preferred_element_type=jnp.float32)
          + bkv_ref[...])

    q3 = q.reshape(Bt, L, D)
    k3 = kv[:, :D].reshape(Bt, L, D)
    v3 = kv[:, D:].reshape(Bt, L, D)

    # head-invariant additive bias: key-padding mask + causal (lower-triangular) mask
    key_ok = mask_t_ref[...] > 0.0                            # (Bt, 1, L)
    rows = lax.broadcasted_iota(jnp.int32, (1, L, L), 1)
    cols = lax.broadcasted_iota(jnp.int32, (1, L, L), 2)
    allowed = jnp.logical_and(key_ok, rows >= cols)           # (Bt, L, L)
    bias = jnp.where(allowed, 0.0, NEG_INF)

    head_outs = []
    for head in range(H):                                     # unrolled; H is small
        sl = slice(head * dh, (head + 1) * dh)
        s = jnp.einsum('bqd,bkd->bqk', q3[:, :, sl], k3[:, :, sl],
                       preferred_element_type=jnp.float32) + bias
        # query mask: padding mask broadcast over keys (attn dropout = identity)
        p = jax.nn.softmax(s, axis=-1) * mask
        head_outs.append(jnp.einsum('bqk,bkd->bqd', p, v3[:, :, sl],
                                    preferred_element_type=jnp.float32))
    attn = jnp.concatenate(head_outs, axis=-1) + seq_norm     # residual: + queries

    # ---- ln_2 then PositionwiseFeedForward (Conv1d k=1 == dense) ----
    y = _layer_norm(attn, ln2_g[...], ln2_b[...])
    y_flat = y.reshape(M, D)
    h1 = jnp.maximum(
        jnp.dot(y_flat, w1_ref[...], preferred_element_type=jnp.float32) + b1_ref[...],
        0.0)
    h2 = jnp.dot(h1, w2_ref[...], preferred_element_type=jnp.float32) + b2_ref[...]
    ff = (h2 + y_flat).reshape(Bt, L, D)                      # residual inside FFN

    # only the last position is read downstream: ff *= mask ; ln_3 ; take row L-1
    last = ff[:, L - 1, :] * mask[:, L - 1, :]                # (Bt, D)
    out_ref[...] = _layer_norm(last, ln3_g[...], ln3_b[...])


def sasrec_forward(sequences, params, *, item_num, num_heads, block_b=None):
    """sequences: (B, L) int32. Returns (B, D) last-step hidden states (the logits)."""
    B, L = sequences.shape
    D = params["pos_emb"].shape[-1]
    assert D % num_heads == 0

    # Glue: embedding lookup (embed_ID) and padding mask in plain JAX.
    inputs_emb = params["item_emb"][sequences]                      # (B, L, D)
    mask2d = (sequences != item_num).astype(jnp.float32)            # (B, L)
    mask = mask2d[..., None]                                        # (B, L, 1)
    mask_t = mask2d[:, None, :]                                     # (B, 1, L)

    if block_b is None:
        block_b = _choose_block_b(B, L, D, num_heads)
    B_pad = _round_up(B, block_b)
    if B_pad != B:
        pad = B_pad - B
        inputs_emb = jnp.pad(inputs_emb, ((0, pad), (0, 0), (0, 0)))
        mask = jnp.pad(mask, ((0, pad), (0, 0), (0, 0)))
        mask_t = jnp.pad(mask_t, ((0, pad), (0, 0), (0, 0)))

    # Fuse K and V projection weights (Q's input is ln_1(seq), so it stays separate).
    wkv = jnp.concatenate([params["wk"], params["wv"]], axis=1)     # (D, 2D)
    bkv = jnp.concatenate([params["bk"], params["bv"]], axis=1)     # (1, 2D)

    weights = [
        params["pos_emb"],
        params["ln1_g"], params["ln1_b"],
        params["wq"], params["bq"], wkv, bkv,
        params["ln2_g"], params["ln2_b"],
        params["w1"], params["b1"], params["w2"], params["b2"],
        params["ln3_g"], params["ln3_b"],
    ]
    wmap = lambda b: (0, 0)
    weight_specs = [pl.BlockSpec(w.shape, wmap) for w in weights]

    kernel = functools.partial(_sasrec_kernel, num_heads=num_heads)

    out = pl.pallas_call(
        kernel,
        out_shape=jax.ShapeDtypeStruct((B_pad, D), jnp.float32),
        grid=(B_pad // block_b,),
        in_specs=[
            pl.BlockSpec((block_b, L, D), lambda b: (b, 0, 0)),   # inputs_emb
            pl.BlockSpec((block_b, L, 1), lambda b: (b, 0, 0)),   # mask
            pl.BlockSpec((block_b, 1, L), lambda b: (b, 0, 0)),   # mask (key layout)
        ] + weight_specs,
        out_specs=pl.BlockSpec((block_b, D), lambda b: (b, 0)),
        compiler_params=pltpu.CompilerParams(
            dimension_semantics=("parallel",),
            vmem_limit_bytes=32 * 1024 * 1024),
    )(inputs_emb, mask, mask_t, *weights)
    return out[:B]


def sasrec_reference(sequences, params, *, item_num, num_heads):
    """Plain-JAX reference of the same forward pass (for a numerical check)."""
    B, L = sequences.shape
    D = params["pos_emb"].shape[-1]
    H = num_heads
    dh = D // H

    x = params["item_emb"][sequences]
    mask = (sequences != item_num).astype(jnp.float32)[..., None]
    seq = (x + params["pos_emb"][None]) * mask

    def ln(v, g, b, eps=1e-5):
        mu = jnp.mean(v, -1, keepdims=True)
        var = jnp.mean((v - mu) ** 2, -1, keepdims=True)
        return (v - mu) * lax.rsqrt(var + eps) * g + b

    seq_n = ln(seq, params["ln1_g"], params["ln1_b"])
    q = seq_n @ params["wq"] + params["bq"]
    k = seq @ params["wk"] + params["bk"]
    v = seq @ params["wv"] + params["bv"]
    scale = 1.0 / jnp.sqrt(jnp.float32(D))

    key_ok = jnp.swapaxes(mask, 1, 2) > 0.0
    causal = jnp.tril(jnp.ones((L, L), bool))[None]
    allowed = key_ok & causal

    outs = []
    for h in range(H):
        sl = slice(h * dh, (h + 1) * dh)
        s = jnp.einsum('bqd,bkd->bqk', q[..., sl], k[..., sl]) * scale
        s = jnp.where(allowed, s, NEG_INF)
        p = jax.nn.softmax(s, -1) * mask
        outs.append(jnp.einsum('bqk,bkd->bqd', p, v[..., sl]))
    attn = jnp.concatenate(outs, -1) + seq_n

    y = ln(attn, params["ln2_g"], params["ln2_b"])
    ff = jnp.maximum(y @ params["w1"] + params["b1"], 0.0) @ params["w2"] + params["b2"] + y
    ff = ff * mask
    ff = ln(ff, params["ln3_g"], params["ln3_b"])
    return ff[:, -1]


def init_params(key, *, item_num, seq_len, hidden_dim):
    ks = jax.random.split(key, 8)
    scale = 0.02
    D = hidden_dim
    return {
        # item embedding table: item_num real items + 1 padding id (== item_num)
        "item_emb": scale * jax.random.normal(ks[0], (item_num + 1, D), jnp.float32),
        "pos_emb":  scale * jax.random.normal(ks[1], (seq_len, D), jnp.float32),
        "ln1_g": jnp.ones((1, D), jnp.float32), "ln1_b": jnp.zeros((1, D), jnp.float32),
        "ln2_g": jnp.ones((1, D), jnp.float32), "ln2_b": jnp.zeros((1, D), jnp.float32),
        "ln3_g": jnp.ones((1, D), jnp.float32), "ln3_b": jnp.zeros((1, D), jnp.float32),
        # attention projections (stored so that x @ W applies them)
        "wq": scale * jax.random.normal(ks[2], (D, D), jnp.float32),
        "bq": jnp.zeros((1, D), jnp.float32),
        "wk": scale * jax.random.normal(ks[3], (D, D), jnp.float32),
        "bk": jnp.zeros((1, D), jnp.float32),
        "wv": scale * jax.random.normal(ks[4], (D, D), jnp.float32),
        "bv": jnp.zeros((1, D), jnp.float32),
        # position-wise FFN (Conv1d kernel-size-1 weights, pre-transposed)
        "w1": scale * jax.random.normal(ks[5], (D, D), jnp.float32),
        "b1": jnp.zeros((1, D), jnp.float32),
        "w2": scale * jax.random.normal(ks[6], (D, D), jnp.float32),
        "b2": jnp.zeros((1, D), jnp.float32),
    }


if __name__ == "__main__":
    B, L, D, H = 2, 8, 32, 2
    ITEM_NUM = 16  # padding id == ITEM_NUM

    key = jax.random.PRNGKey(0)
    pkey, skey = jax.random.split(key)
    params = init_params(pkey, item_num=ITEM_NUM, seq_len=L, hidden_dim=D)

    sequences = jax.random.randint(skey, (B, L), 0, ITEM_NUM, dtype=jnp.int32)
    # introduce some padding positions to exercise the mask path
    sequences = sequences.at[0, :2].set(ITEM_NUM)
    sequences = sequences.at[1, :1].set(ITEM_NUM)

    logits = sasrec_forward(sequences, params, item_num=ITEM_NUM, num_heads=H)
    logits = jax.block_until_ready(logits)
    assert logits.shape == (B, D)

    ref = sasrec_reference(sequences, params, item_num=ITEM_NUM, num_heads=H)
    max_err = float(jnp.max(jnp.abs(logits - ref)))
    assert jnp.allclose(logits, ref, atol=2e-3, rtol=2e-3), f"max_err={max_err}"

    print("KERNEL_OK")
</pallas_src>

<mosaic_0001>
module attributes {stable_mosaic.version = 11 : i64} {
  func.func @_sasrec_kernel(%arg0: i32, %arg1: memref<8x8x32xf32, #tpu.memory_space<vmem>>, %arg2: memref<8x8x1xf32, #tpu.memory_space<vmem>>, %arg3: memref<8x1x8xf32, #tpu.memory_space<vmem>>, %arg4: memref<8x32xf32, #tpu.memory_space<vmem>>, %arg5: memref<1x32xf32, #tpu.memory_space<vmem>>, %arg6: memref<1x32xf32, #tpu.memory_space<vmem>>, %arg7: memref<32x32xf32, #tpu.memory_space<vmem>>, %arg8: memref<1x32xf32, #tpu.memory_space<vmem>>, %arg9: memref<32x64xf32, #tpu.memory_space<vmem>>, %arg10: memref<1x64xf32, #tpu.memory_space<vmem>>, %arg11: memref<1x32xf32, #tpu.memory_space<vmem>>, %arg12: memref<1x32xf32, #tpu.memory_space<vmem>>, %arg13: memref<32x32xf32, #tpu.memory_space<vmem>>, %arg14: memref<1x32xf32, #tpu.memory_space<vmem>>, %arg15: memref<32x32xf32, #tpu.memory_space<vmem>>, %arg16: memref<1x32xf32, #tpu.memory_space<vmem>>, %arg17: memref<1x32xf32, #tpu.memory_space<vmem>>, %arg18: memref<1x32xf32, #tpu.memory_space<vmem>>, %arg19: memref<8x32xf32, #tpu.memory_space<vmem>>) attributes {dimension_semantics = [#tpu.dimension_semantics<parallel>], iteration_bounds = array<i64: 1>, scalar_prefetch = 0 : i64, scratch_operands = 0 : i64, tpu.core_type = #tpu.core_type<tc>, window_params = [{transform_indices = @transform_0, window_bounds = array<i64: 8, 8, 32>}, {transform_indices = @transform_1, window_bounds = array<i64: 8, 8, 1>}, {transform_indices = @transform_2, window_bounds = array<i64: 8, 1, 8>}, {pipeline_mode = #tpu.pipeline_mode<synchronous>, transform_indices = @transform_3, window_bounds = array<i64: 8, 32>}, {pipeline_mode = #tpu.pipeline_mode<synchronous>, transform_indices = @transform_4, window_bounds = array<i64: 1, 32>}, {pipeline_mode = #tpu.pipeline_mode<synchronous>, transform_indices = @transform_5, window_bounds = array<i64: 1, 32>}, {pipeline_mode = #tpu.pipeline_mode<synchronous>, transform_indices = @transform_6, window_bounds = array<i64: 32, 32>}, {pipeline_mode = #tpu.pipeline_mode<synchronous>, transform_indices = @transform_7, window_bounds = array<i64: 1, 32>}, {pipeline_mode = #tpu.pipeline_mode<synchronous>, transform_indices = @transform_8, window_bounds = array<i64: 32, 64>}, {pipeline_mode = #tpu.pipeline_mode<synchronous>, transform_indices = @transform_9, window_bounds = array<i64: 1, 64>}, {pipeline_mode = #tpu.pipeline_mode<synchronous>, transform_indices = @transform_10, window_bounds = array<i64: 1, 32>}, {pipeline_mode = #tpu.pipeline_mode<synchronous>, transform_indices = @transform_11, window_bounds = array<i64: 1, 32>}, {pipeline_mode = #tpu.pipeline_mode<synchronous>, transform_indices = @transform_12, window_bounds = array<i64: 32, 32>}, {pipeline_mode = #tpu.pipeline_mode<synchronous>, transform_indices = @transform_13, window_bounds = array<i64: 1, 32>}, {pipeline_mode = #tpu.pipeline_mode<synchronous>, transform_indices = @transform_14, window_bounds = array<i64: 32, 32>}, {pipeline_mode = #tpu.pipeline_mode<synchronous>, transform_indices = @transform_15, window_bounds = array<i64: 1, 32>}, {pipeline_mode = #tpu.pipeline_mode<synchronous>, transform_indices = @transform_16, window_bounds = array<i64: 1, 32>}, {pipeline_mode = #tpu.pipeline_mode<synchronous>, transform_indices = @transform_17, window_bounds = array<i64: 1, 32>}, {transform_indices = @transform_18, window_bounds = array<i64: 8, 32>}]} {
    %c0 = arith.constant 0 : index
    %c0_0 = arith.constant 0 : index
    %c0_1 = arith.constant 0 : index
    %0 = vector.load %arg2[%c0, %c0_0, %c0_1] : memref<8x8x1xf32, #tpu.memory_space<vmem>>, vector<8x8x1xf32>
    %c0_2 = arith.constant 0 : index
    %c0_3 = arith.constant 0 : index
    %c0_4 = arith.constant 0 : index
    %1 = vector.load %arg1[%c0_2, %c0_3, %c0_4] : memref<8x8x32xf32, #tpu.memory_space<vmem>>, vector<8x8x32xf32>
    %c0_5 = arith.constant 0 : index
    %c0_6 = arith.constant 0 : index
    %2 = vector.load %arg4[%c0_5, %c0_6] : memref<8x32xf32, #tpu.memory_space<vmem>>, vector<8x32xf32>
    %3 = vector.shape_cast %2 : vector<8x32xf32> to vector<1x8x32xf32>
    %4 = vector.broadcast %3 : vector<1x8x32xf32> to vector<8x8x32xf32>
    %5 = arith.addf %1, %4 : vector<8x8x32xf32>
    %6 = vector.broadcast %0 : vector<8x8x1xf32> to vector<8x8x32xf32>
    %7 = arith.mulf %5, %6 : vector<8x8x32xf32>
    %c0_7 = arith.constant 0 : index
    %c0_8 = arith.constant 0 : index
    %8 = vector.load %arg5[%c0_7, %c0_8] : memref<1x32xf32, #tpu.memory_space<vmem>>, vector<1x32xf32>
    %c0_9 = arith.constant 0 : index
    %c0_10 = arith.constant 0 : index
    %9 = vector.load %arg6[%c0_9, %c0_10] : memref<1x32xf32, #tpu.memory_space<vmem>>, vector<1x32xf32>
    %cst = arith.constant dense<0.000000e+00> : vector<8x8xf32>
    %10 = vector.multi_reduction <add>, %7, %cst [2] : vector<8x8x32xf32> to vector<8x8xf32>
    %11 = vector.shape_cast %10 : vector<8x8xf32> to vector<8x8x1xf32>
    %cst_11 = arith.constant 3.200000e+01 : f32
    %12 = vector.broadcast %cst_11 : f32 to vector<8x8x1xf32>
    %13 = arith.divf %11, %12 : vector<8x8x1xf32>
    %14 = vector.broadcast %13 : vector<8x8x1xf32> to vector<8x8x32xf32>
    %15 = arith.subf %7, %14 : vector<8x8x32xf32>
    %16 = arith.mulf %15, %15 : vector<8x8x32xf32>
    %cst_12 = arith.constant dense<0.000000e+00> : vector<8x8xf32>
    %17 = vector.multi_reduction <add>, %16, %cst_12 [2] : vector<8x8x32xf32> to vector<8x8xf32>
    %18 = vector.shape_cast %17 : vector<8x8xf32> to vector<8x8x1xf32>
    %cst_13 = arith.constant 3.200000e+01 : f32
    %19 = vector.broadcast %cst_13 : f32 to vector<8x8x1xf32>
    %20 = arith.divf %18, %19 : vector<8x8x1xf32>
    %21 = vector.broadcast %13 : vector<8x8x1xf32> to vector<8x8x32xf32>
    %22 = arith.subf %7, %21 : vector<8x8x32xf32>
    %cst_14 = arith.constant 9.99999974E-6 : f32
    %23 = vector.broadcast %cst_14 : f32 to vector<8x8x1xf32>
    %24 = arith.addf %20, %23 : vector<8x8x1xf32>
    %25 = math.rsqrt %24 : vector<8x8x1xf32>
    %26 = vector.broadcast %25 : vector<8x8x1xf32> to vector<8x8x32xf32>
    %27 = arith.mulf %22, %26 : vector<8x8x32xf32>
    %28 = vector.shape_cast %8 : vector<1x32xf32> to vector<1x1x32xf32>
    %29 = vector.broadcast %28 : vector<1x1x32xf32> to vector<8x8x32xf32>
    %30 = arith.mulf %27, %29 : vector<8x8x32xf32>
    %31 = vector.shape_cast %9 : vector<1x32xf32> to vector<1x1x32xf32>
    %32 = vector.broadcast %31 : vector<1x1x32xf32> to vector<8x8x32xf32>
    %33 = arith.addf %30, %32 : vector<8x8x32xf32>
    %34 = vector.shape_cast %7 : vector<8x8x32xf32> to vector<64x32xf32>
    %35 = vector.shape_cast %33 : vector<8x8x32xf32> to vector<64x32xf32>
    %cst_15 = arith.constant 3.200000e+01 : f32
    %36 = math.sqrt %cst_15 : f32
    %cst_16 = arith.constant 1.000000e+00 : f32
    %37 = arith.divf %cst_16, %36 : f32
    %c0_17 = arith.constant 0 : index
    %c0_18 = arith.constant 0 : index
    %38 = vector.load %arg7[%c0_17, %c0_18] : memref<32x32xf32, #tpu.memory_space<vmem>>, vector<32x32xf32>
    %cst_19 = arith.constant dense<0.000000e+00> : vector<64x32xf32>
    %39 = tpu.matmul %35, %38, %cst_19 {dimension_numbers = #tpu.dot_dimension_numbers<[1], [0], [0], [1], [0, 0, 1, 1], [], []>} : vector<64x32xf32>, vector<32x32xf32>, vector<64x32xf32> -> vector<64x32xf32>
    %c0_20 = arith.constant 0 : index
    %c0_21 = arith.constant 0 : index
    %40 = vector.load %arg8[%c0_20, %c0_21] : memref<1x32xf32, #tpu.memory_space<vmem>>, vector<1x32xf32>
    %41 = vector.broadcast %40 : vector<1x32xf32> to vector<64x32xf32>
    %42 = arith.addf %39, %41 : vector<64x32xf32>
    %43 = vector.broadcast %37 : f32 to vector<64x32xf32>
    %44 = arith.mulf %42, %43 : vector<64x32xf32>
    %c0_22 = arith.constant 0 : index
    %c0_23 = arith.constant 0 : index
    %45 = vector.load %arg9[%c0_22, %c0_23] : memref<32x64xf32, #tpu.memory_space<vmem>>, vector<32x64xf32>
    %cst_24 = arith.constant dense<0.000000e+00> : vector<64x64xf32>
    %46 = tpu.matmul %34, %45, %cst_24 {dimension_numbers = #tpu.dot_dimension_numbers<[1], [0], [0], [1], [0, 0, 1, 1], [], []>} : vector<64x32xf32>, vector<32x64xf32>, vector<64x64xf32> -> vector<64x64xf32>
    %c0_25 = arith.constant 0 : index
    %c0_26 = arith.constant 0 : index
    %47 = vector.load %arg10[%c0_25, %c0_26] : memref<1x64xf32, #tpu.memory_space<vmem>>, vector<1x64xf32>
    %48 = vector.broadcast %47 : vector<1x64xf32> to vector<64x64xf32>
    %49 = arith.addf %46, %48 : vector<64x64xf32>
    %50 = vector.shape_cast %44 : vector<64x32xf32> to vector<8x8x32xf32>
    %51 = vector.extract_strided_slice %49 {offsets = [0, 0], sizes = [64, 32], strides = [1, 1]} : vector<64x64xf32> to vector<64x32xf32>
    %52 = vector.shape_cast %51 : vector<64x32xf32> to vector<8x8x32xf32>
    %53 = vector.extract_strided_slice %49 {offsets = [0, 32], sizes = [64, 32], strides = [1, 1]} : vector<64x64xf32> to vector<64x32xf32>
    %54 = vector.shape_cast %53 : vector<64x32xf32> to vector<8x8x32xf32>
    %c0_27 = arith.constant 0 : index
    %c0_28 = arith.constant 0 : index
    %c0_29 = arith.constant 0 : index
    %55 = vector.load %arg3[%c0_27, %c0_28, %c0_29] : memref<8x1x8xf32, #tpu.memory_space<vmem>>, vector<8x1x8xf32>
    %cst_30 = arith.constant 0.000000e+00 : f32
    %56 = vector.broadcast %cst_30 : f32 to vector<8x1x8xf32>
    %57 = arith.cmpf ogt, %55, %56 : vector<8x1x8xf32>
    %58 = tpu.iota {dimensions = array<i32: 1>} : vector<1x8x8xi32>
    %59 = tpu.iota {dimensions = array<i32: 2>} : vector<1x8x8xi32>
    %60 = arith.cmpi sge, %58, %59 : vector<1x8x8xi32>
    %61 = vector.broadcast %57 : vector<8x1x8xi1> to vector<8x8x8xi1>
    %62 = vector.broadcast %60 : vector<1x8x8xi1> to vector<8x8x8xi1>
    %63 = arith.andi %61, %62 : vector<8x8x8xi1>
    %cst_31 = arith.constant 0.000000e+00 : f32
    %cst_32 = arith.constant -4.2949673E+9 : f32
    %64 = vector.broadcast %cst_31 : f32 to vector<8x8x8xf32>
    %65 = vector.broadcast %cst_32 : f32 to vector<8x8x8xf32>
    %66 = arith.select %63, %64, %65 : vector<8x8x8xi1>, vector<8x8x8xf32>
    %67 = vector.extract_strided_slice %50 {offsets = [0, 0, 0], sizes = [8, 8, 16], strides = [1, 1, 1]} : vector<8x8x32xf32> to vector<8x8x16xf32>
    %68 = vector.extract_strided_slice %52 {offsets = [0, 0, 0], sizes = [8, 8, 16], strides = [1, 1, 1]} : vector<8x8x32xf32> to vector<8x8x16xf32>
    "tpu.trace_start"() <{level = 10 : i32, message = "bqd,bkd->bqk"}> : () -> ()
    %cst_33 = arith.constant dense<0.000000e+00> : vector<8x8x8xf32>
    %69 = tpu.matmul %67, %68, %cst_33 {dimension_numbers = #tpu.dot_dimension_numbers<[2], [2], [1], [1], [0, 0, 0, 1, 1, 1], [0], [0]>} : vector<8x8x16xf32>, vector<8x8x16xf32>, vector<8x8x8xf32> -> vector<8x8x8xf32>
    "tpu.trace_stop"() : () -> ()
    %70 = arith.addf %69, %66 : vector<8x8x8xf32>
    %cst_34 = arith.constant dense<0xFF800000> : vector<8x8xf32>
    %71 = vector.multi_reduction <maximumf>, %70, %cst_34 [2] : vector<8x8x8xf32> to vector<8x8xf32>
    %cst_35 = arith.constant 0xFF800000 : f32
    %72 = vector.broadcast %cst_35 : f32 to vector<8x8xf32>
    %73 = arith.maximumf %72, %71 : vector<8x8xf32>
    %74 = vector.shape_cast %73 : vector<8x8xf32> to vector<8x8x1xf32>
    %75 = vector.broadcast %74 : vector<8x8x1xf32> to vector<8x8x8xf32>
    %76 = arith.subf %70, %75 : vector<8x8x8xf32>
    %77 = math.exp %76 : vector<8x8x8xf32>
    %cst_36 = arith.constant dense<0.000000e+00> : vector<8x8xf32>
    %78 = vector.multi_reduction <add>, %77, %cst_36 [2] : vector<8x8x8xf32> to vector<8x8xf32>
    %79 = vector.shape_cast %78 : vector<8x8xf32> to vector<8x8x1xf32>
    %80 = vector.broadcast %79 : vector<8x8x1xf32> to vector<8x8x8xf32>
    %81 = arith.divf %77, %80 : vector<8x8x8xf32>
    %82 = vector.broadcast %0 : vector<8x8x1xf32> to vector<8x8x8xf32>
    %83 = arith.mulf %81, %82 : vector<8x8x8xf32>
    %84 = vector.extract_strided_slice %54 {offsets = [0, 0, 0], sizes = [8, 8, 16], strides = [1, 1, 1]} : vector<8x8x32xf32> to vector<8x8x16xf32>
    "tpu.trace_start"() <{level = 10 : i32, message = "bqk,bkd->bqd"}> : () -> ()
    %cst_37 = arith.constant dense<0.000000e+00> : vector<8x8x16xf32>
    %85 = tpu.matmul %83, %84, %cst_37 {dimension_numbers = #tpu.dot_dimension_numbers<[2], [1], [1], [2], [0, 0, 0, 1, 1, 2], [0], [0]>} : vector<8x8x8xf32>, vector<8x8x16xf32>, vector<8x8x16xf32> -> vector<8x8x16xf32>
    "tpu.trace_stop"() : () -> ()
    %86 = vector.extract_strided_slice %50 {offsets = [0, 0, 16], sizes = [8, 8, 16], strides = [1, 1, 1]} : vector<8x8x32xf32> to vector<8x8x16xf32>
    %87 = vector.extract_strided_slice %52 {offsets = [0, 0, 16], sizes = [8, 8, 16], strides = [1, 1, 1]} : vector<8x8x32xf32> to vector<8x8x16xf32>
    "tpu.trace_start"() <{level = 10 : i32, message = "bqd,bkd->bqk"}> : () -> ()
    %cst_38 = arith.constant dense<0.000000e+00> : vector<8x8x8xf32>
    %88 = tpu.matmul %86, %87, %cst_38 {dimension_numbers = #tpu.dot_dimension_numbers<[2], [2], [1], [1], [0, 0, 0, 1, 1, 1], [0], [0]>} : vector<8x8x16xf32>, vector<8x8x16xf32>, vector<8x8x8xf32> -> vector<8x8x8xf32>
    "tpu.trace_stop"() : () -> ()
    %89 = arith.addf %88, %66 : vector<8x8x8xf32>
    %cst_39 = arith.constant dense<0xFF800000> : vector<8x8xf32>
    %90 = vector.multi_reduction <maximumf>, %89, %cst_39 [2] : vector<8x8x8xf32> to vector<8x8xf32>
    %cst_40 = arith.constant 0xFF800000 : f32
    %91 = vector.broadcast %cst_40 : f32 to vector<8x8xf32>
    %92 = arith.maximumf %91, %90 : vector<8x8xf32>
    %93 = vector.shape_cast %92 : vector<8x8xf32> to vector<8x8x1xf32>
    %94 = vector.broadcast %93 : vector<8x8x1xf32> to vector<8x8x8xf32>
    %95 = arith.subf %89, %94 : vector<8x8x8xf32>
    %96 = math.exp %95 : vector<8x8x8xf32>
    %cst_41 = arith.constant dense<0.000000e+00> : vector<8x8xf32>
    %97 = vector.multi_reduction <add>, %96, %cst_41 [2] : vector<8x8x8xf32> to vector<8x8xf32>
    %98 = vector.shape_cast %97 : vector<8x8xf32> to vector<8x8x1xf32>
    %99 = vector.broadcast %98 : vector<8x8x1xf32> to vector<8x8x8xf32>
    %100 = arith.divf %96, %99 : vector<8x8x8xf32>
    %101 = vector.broadcast %0 : vector<8x8x1xf32> to vector<8x8x8xf32>
    %102 = arith.mulf %100, %101 : vector<8x8x8xf32>
    %103 = vector.extract_strided_slice %54 {offsets = [0, 0, 16], sizes = [8, 8, 16], strides = [1, 1, 1]} : vector<8x8x32xf32> to vector<8x8x16xf32>
    "tpu.trace_start"() <{level = 10 : i32, message = "bqk,bkd->bqd"}> : () -> ()
    %cst_42 = arith.constant dense<0.000000e+00> : vector<8x8x16xf32>
    %104 = tpu.matmul %102, %103, %cst_42 {dimension_numbers = #tpu.dot_dimension_numbers<[2], [1], [1], [2], [0, 0, 0, 1, 1, 2], [0], [0]>} : vector<8x8x8xf32>, vector<8x8x16xf32>, vector<8x8x16xf32> -> vector<8x8x16xf32>
    "tpu.trace_stop"() : () -> ()
    %105 = tpu.concatenate %85, %104 in 2 : vector<8x8x16xf32>, vector<8x8x16xf32> -> vector<8x8x32xf32>
    %106 = arith.addf %105, %33 : vector<8x8x32xf32>
    %c0_43 = arith.constant 0 : index
    %c0_44 = arith.constant 0 : index
    %107 = vector.load %arg11[%c0_43, %c0_44] : memref<1x32xf32, #tpu.memory_space<vmem>>, vector<1x32xf32>
    %c0_45 = arith.constant 0 : index
    %c0_46 = arith.constant 0 : index
    %108 = vector.load %arg12[%c0_45, %c0_46] : memref<1x32xf32, #tpu.memory_space<vmem>>, vector<1x32xf32>
    %cst_47 = arith.constant dense<0.000000e+00> : vector<8x8xf32>
    %109 = vector.multi_reduction <add>, %106, %cst_47 [2] : vector<8x8x32xf32> to vector<8x8xf32>
    %110 = vector.shape_cast %109 : vector<8x8xf32> to vector<8x8x1xf32>
    %cst_48 = arith.constant 3.200000e+01 : f32
    %111 = vector.broadcast %cst_48 : f32 to vector<8x8x1xf32>
    %112 = arith.divf %110, %111 : vector<8x8x1xf32>
    %113 = vector.broadcast %112 : vector<8x8x1xf32> to vector<8x8x32xf32>
    %114 = arith.subf %106, %113 : vector<8x8x32xf32>
    %115 = arith.mulf %114, %114 : vector<8x8x32xf32>
    %cst_49 = arith.constant dense<0.000000e+00> : vector<8x8xf32>
    %116 = vector.multi_reduction <add>, %115, %cst_49 [2] : vector<8x8x32xf32> to vector<8x8xf32>
    %117 = vector.shape_cast %116 : vector<8x8xf32> to vector<8x8x1xf32>
    %cst_50 = arith.constant 3.200000e+01 : f32
    %118 = vector.broadcast %cst_50 : f32 to vector<8x8x1xf32>
    %119 = arith.divf %117, %118 : vector<8x8x1xf32>
    %120 = vector.broadcast %112 : vector<8x8x1xf32> to vector<8x8x32xf32>
    %121 = arith.subf %106, %120 : vector<8x8x32xf32>
    %cst_51 = arith.constant 9.99999974E-6 : f32
    %122 = vector.broadcast %cst_51 : f32 to vector<8x8x1xf32>
    %123 = arith.addf %119, %122 : vector<8x8x1xf32>
    %124 = math.rsqrt %123 : vector<8x8x1xf32>
    %125 = vector.broadcast %124 : vector<8x8x1xf32> to vector<8x8x32xf32>
    %126 = arith.mulf %121, %125 : vector<8x8x32xf32>
    %127 = vector.shape_cast %107 : vector<1x32xf32> to vector<1x1x32xf32>
    %128 = vector.broadcast %127 : vector<1x1x32xf32> to vector<8x8x32xf32>
    %129 = arith.mulf %126, %128 : vector<8x8x32xf32>
    %130 = vector.shape_cast %108 : vector<1x32xf32> to vector<1x1x32xf32>
    %131 = vector.broadcast %130 : vector<1x1x32xf32> to vector<8x8x32xf32>
    %132 = arith.addf %129, %131 : vector<8x8x32xf32>
    %133 = vector.shape_cast %132 : vector<8x8x32xf32> to vector<64x32xf32>
    %c0_52 = arith.constant 0 : index
    %c0_53 = arith.constant 0 : index
    %134 = vector.load %arg13[%c0_52, %c0_53] : memref<32x32xf32, #tpu.memory_space<vmem>>, vector<32x32xf32>
    %cst_54 = arith.constant dense<0.000000e+00> : vector<64x32xf32>
    %135 = tpu.matmul %133, %134, %cst_54 {dimension_numbers = #tpu.dot_dimension_numbers<[1], [0], [0], [1], [0, 0, 1, 1], [], []>} : vector<64x32xf32>, vector<32x32xf32>, vector<64x32xf32> -> vector<64x32xf32>
    %c0_55 = arith.constant 0 : index
    %c0_56 = arith.constant 0 : index
    %136 = vector.load %arg14[%c0_55, %c0_56] : memref<1x32xf32, #tpu.memory_space<vmem>>, vector<1x32xf32>
    %137 = vector.broadcast %136 : vector<1x32xf32> to vector<64x32xf32>
    %138 = arith.addf %135, %137 : vector<64x32xf32>
    %cst_57 = arith.constant 0.000000e+00 : f32
    %139 = vector.broadcast %cst_57 : f32 to vector<64x32xf32>
    %140 = arith.maximumf %138, %139 : vector<64x32xf32>
    %c0_58 = arith.constant 0 : index
    %c0_59 = arith.constant 0 : index
    %141 = vector.load %arg15[%c0_58, %c0_59] : memref<32x32xf32, #tpu.memory_space<vmem>>, vector<32x32xf32>
    %cst_60 = arith.constant dense<0.000000e+00> : vector<64x32xf32>
    %142 = tpu.matmul %140, %141, %cst_60 {dimension_numbers = #tpu.dot_dimension_numbers<[1], [0], [0], [1], [0, 0, 1, 1], [], []>} : vector<64x32xf32>, vector<32x32xf32>, vector<64x32xf32> -> vector<64x32xf32>
    %c0_61 = arith.constant 0 : index
    %c0_62 = arith.constant 0 : index
    %143 = vector.load %arg16[%c0_61, %c0_62] : memref<1x32xf32, #tpu.memory_space<vmem>>, vector<1x32xf32>
    %144 = vector.broadcast %143 : vector<1x32xf32> to vector<64x32xf32>
    %145 = arith.addf %142, %144 : vector<64x32xf32>
    %146 = arith.addf %145, %133 : vector<64x32xf32>
    %147 = vector.shape_cast %146 : vector<64x32xf32> to vector<8x8x32xf32>
    %148 = vector.extract_strided_slice %147 {offsets = [0, 7, 0], sizes = [8, 1, 32], strides = [1, 1, 1]} : vector<8x8x32xf32> to vector<8x1x32xf32>
    %149 = vector.shape_cast %148 : vector<8x1x32xf32> to vector<8x32xf32>
    %150 = vector.extract_strided_slice %0 {offsets = [0, 7, 0], sizes = [8, 1, 1], strides = [1, 1, 1]} : vector<8x8x1xf32> to vector<8x1x1xf32>
    %151 = vector.shape_cast %150 : vector<8x1x1xf32> to vector<8x1xf32>
    %152 = vector.broadcast %151 : vector<8x1xf32> to vector<8x32xf32>
    %153 = arith.mulf %149, %152 : vector<8x32xf32>
    %c0_63 = arith.constant 0 : index
    %c0_64 = arith.constant 0 : index
    %154 = vector.load %arg17[%c0_63, %c0_64] : memref<1x32xf32, #tpu.memory_space<vmem>>, vector<1x32xf32>
    %c0_65 = arith.constant 0 : index
    %c0_66 = arith.constant 0 : index
    %155 = vector.load %arg18[%c0_65, %c0_66] : memref<1x32xf32, #tpu.memory_space<vmem>>, vector<1x32xf32>
    %cst_67 = arith.constant dense<0.000000e+00> : vector<8xf32>
    %156 = vector.multi_reduction <add>, %153, %cst_67 [1] : vector<8x32xf32> to vector<8xf32>
    %157 = vector.shape_cast %156 : vector<8xf32> to vector<8x1xf32>
    %cst_68 = arith.constant 3.200000e+01 : f32
    %158 = vector.broadcast %cst_68 : f32 to vector<8x1xf32>
    %159 = arith.divf %157, %158 : vector<8x1xf32>
    %160 = vector.broadcast %159 : vector<8x1xf32> to vector<8x32xf32>
    %161 = arith.subf %153, %160 : vector<8x32xf32>
    %162 = arith.mulf %161, %161 : vector<8x32xf32>
    %cst_69 = arith.constant dense<0.000000e+00> : vector<8xf32>
    %163 = vector.multi_reduction <add>, %162, %cst_69 [1] : vector<8x32xf32> to vector<8xf32>
    %164 = vector.shape_cast %163 : vector<8xf32> to vector<8x1xf32>
    %cst_70 = arith.constant 3.200000e+01 : f32
    %165 = vector.broadcast %cst_70 : f32 to vector<8x1xf32>
    %166 = arith.divf %164, %165 : vector<8x1xf32>
    %167 = vector.broadcast %159 : vector<8x1xf32> to vector<8x32xf32>
    %168 = arith.subf %153, %167 : vector<8x32xf32>
    %cst_71 = arith.constant 9.99999974E-6 : f32
    %169 = vector.broadcast %cst_71 : f32 to vector<8x1xf32>
    %170 = arith.addf %166, %169 : vector<8x1xf32>
    %171 = math.rsqrt %170 : vector<8x1xf32>
    %172 = vector.broadcast %171 : vector<8x1xf32> to vector<8x32xf32>
    %173 = arith.mulf %168, %172 : vector<8x32xf32>
    %174 = vector.broadcast %154 : vector<1x32xf32> to vector<8x32xf32>
    %175 = arith.mulf %173, %174 : vector<8x32xf32>
    %176 = vector.broadcast %155 : vector<1x32xf32> to vector<8x32xf32>
    %177 = arith.addf %175, %176 : vector<8x32xf32>
    %c0_72 = arith.constant 0 : index
    %c0_73 = arith.constant 0 : index
    %178 = vector.load %arg19[%c0_72, %c0_73] : memref<8x32xf32, #tpu.memory_space<vmem>>, vector<8x32xf32>
    tpu.vector_store %arg19[%c0_72, %c0_73], %177 {strides = array<i32>} : memref<8x32xf32, #tpu.memory_space<vmem>>, vector<8x32xf32>,
    return
  }
  func.func @transform_0(%arg0: i32) -> (i32, i32, i32) {
    %c0_i32 = arith.constant 0 : i32
    %c0_i32_0 = arith.constant 0 : i32
    %c0_i32_1 = arith.constant 0 : i32
    return %arg0, %c0_i32, %c0_i32_0 : i32, i32, i32
  }
  func.func @transform_1(%arg0: i32) -> (i32, i32, i32) {
    %c0_i32 = arith.constant 0 : i32
    %c0_i32_0 = arith.constant 0 : i32
    %c0_i32_1 = arith.constant 0 : i32
    return %arg0, %c0_i32, %c0_i32_0 : i32, i32, i32
  }
  func.func @transform_2(%arg0: i32) -> (i32, i32, i32) {
    %c0_i32 = arith.constant 0 : i32
    %c0_i32_0 = arith.constant 0 : i32
    %c0_i32_1 = arith.constant 0 : i32
    return %arg0, %c0_i32, %c0_i32_0 : i32, i32, i32
  }
  func.func @transform_3(%arg0: i32) -> (i32, i32) {
    %c0_i32 = arith.constant 0 : i32
    %c0_i32_0 = arith.constant 0 : i32
    %c0_i32_1 = arith.constant 0 : i32
    return %c0_i32, %c0_i32_0 : i32, i32
  }
  func.func @transform_4(%arg0: i32) -> (i32, i32) {
    %c0_i32 = arith.constant 0 : i32
    %c0_i32_0 = arith.constant 0 : i32
    %c0_i32_1 = arith.constant 0 : i32
    return %c0_i32, %c0_i32_0 : i32, i32
  }
  func.func @transform_5(%arg0: i32) -> (i32, i32) {
    %c0_i32 = arith.constant 0 : i32
    %c0_i32_0 = arith.constant 0 : i32
    %c0_i32_1 = arith.constant 0 : i32
    return %c0_i32, %c0_i32_0 : i32, i32
  }
  func.func @transform_6(%arg0: i32) -> (i32, i32) {
    %c0_i32 = arith.constant 0 : i32
    %c0_i32_0 = arith.constant 0 : i32
    %c0_i32_1 = arith.constant 0 : i32
    return %c0_i32, %c0_i32_0 : i32, i32
  }
  func.func @transform_7(%arg0: i32) -> (i32, i32) {
    %c0_i32 = arith.constant 0 : i32
    %c0_i32_0 = arith.constant 0 : i32
    %c0_i32_1 = arith.constant 0 : i32
    return %c0_i32, %c0_i32_0 : i32, i32
  }
  func.func @transform_8(%arg0: i32) -> (i32, i32) {
    %c0_i32 = arith.constant 0 : i32
    %c0_i32_0 = arith.constant 0 : i32
    %c0_i32_1 = arith.constant 0 : i32
    return %c0_i32, %c0_i32_0 : i32, i32
  }
  func.func @transform_9(%arg0: i32) -> (i32, i32) {
    %c0_i32 = arith.constant 0 : i32
    %c0_i32_0 = arith.constant 0 : i32
    %c0_i32_1 = arith.constant 0 : i32
    return %c0_i32, %c0_i32_0 : i32, i32
  }
  func.func @transform_10(%arg0: i32) -> (i32, i32) {
    %c0_i32 = arith.constant 0 : i32
    %c0_i32_0 = arith.constant 0 : i32
    %c0_i32_1 = arith.constant 0 : i32
    return %c0_i32, %c0_i32_0 : i32, i32
  }
  func.func @transform_11(%arg0: i32) -> (i32, i32) {
    %c0_i32 = arith.constant 0 : i32
    %c0_i32_0 = arith.constant 0 : i32
    %c0_i32_1 = arith.constant 0 : i32
    return %c0_i32, %c0_i32_0 : i32, i32
  }
  func.func @transform_12(%arg0: i32) -> (i32, i32) {
    %c0_i32 = arith.constant 0 : i32
    %c0_i32_0 = arith.constant 0 : i32
    %c0_i32_1 = arith.constant 0 : i32
    return %c0_i32, %c0_i32_0 : i32, i32
  }
  func.func @transform_13(%arg0: i32) -> (i32, i32) {
    %c0_i32 = arith.constant 0 : i32
    %c0_i32_0 = arith.constant 0 : i32
    %c0_i32_1 = arith.constant 0 : i32
    return %c0_i32, %c0_i32_0 : i32, i32
  }
  func.func @transform_14(%arg0: i32) -> (i32, i32) {
    %c0_i32 = arith.constant 0 : i32
    %c0_i32_0 = arith.constant 0 : i32
    %c0_i32_1 = arith.constant 0 : i32
    return %c0_i32, %c0_i32_0 : i32, i32
  }
  func.func @transform_15(%arg0: i32) -> (i32, i32) {
    %c0_i32 = arith.constant 0 : i32
    %c0_i32_0 = arith.constant 0 : i32
    %c0_i32_1 = arith.constant 0 : i32
    return %c0_i32, %c0_i32_0 : i32, i32
  }
  func.func @transform_16(%arg0: i32) -> (i32, i32) {
    %c0_i32 = arith.constant 0 : i32
    %c0_i32_0 = arith.constant 0 : i32
    %c0_i32_1 = arith.constant 0 : i32
    return %c0_i32, %c0_i32_0 : i32, i32
  }
  func.func @transform_17(%arg0: i32) -> (i32, i32) {
    %c0_i32 = arith.constant 0 : i32
    %c0_i32_0 = arith.constant 0 : i32
    %c0_i32_1 = arith.constant 0 : i32
    return %c0_i32, %c0_i32_0 : i32, i32
  }
  func.func @transform_18(%arg0: i32) -> (i32, i32) {
    %c0_i32 = arith.constant 0 : i32
    %c0_i32_0 = arith.constant 0 : i32
    return %arg0, %c0_i32 : i32, i32
  }
}

</mosaic_0001>

<bundles_post_ra>
// kernel: tpu_custom_call.1
= control target key start
LH: loop header
LB: loop body
LE: loop exit
PB: predicated region body
PF: predicated region fallthrough
CT: control target
= control target key end

     0   :  { %s4032_s0 = inlined_call_operand.vmem [shape: f32[8,8,32], index: 0, kind: input, shape index: {}]   ;;  %s4033_s1 = inlined_call_operand.vmem [shape: f32[8,8,1], index: 1, kind: input, shape index: {}]   ;;  %s4034_s2 = inlined_call_operand.vmem [shape: f32[8,1,8], index: 2, kind: input, shape index: {}]   ;;  %s4035_s3 = inlined_call_operand.hbm [shape: f32[8,32], index: 3, kind: input, shape index: {}]   ;;  %s4036_s4 = inlined_call_operand.vmem [shape: f32[1,32], index: 4, kind: input, shape index: {}]   ;;  %s4037_s5 = inlined_call_operand.vmem [shape: f32[1,32], index: 5, kind: input, shape index: {}]   ;;  %s4038_s6 = inlined_call_operand.hbm [shape: f32[32,32], index: 6, kind: input, shape index: {}]   ;;  %s4039_s7 = inlined_call_operand.vmem [shape: f32[1,32], index: 7, kind: input, shape index: {}]   ;;  %s4040_s8 = inlined_call_operand.hbm [shape: f32[32,64], index: 8, kind: input, shape index: {}]   ;;  %s4041_s9 = inlined_call_operand.vmem [shape: f32[1,64], index: 9, kind: input, shape index: {}]   ;;  %s4042_s10 = inlined_call_operand.vmem [shape: f32[1,32], index: 10, kind: input, shape index: {}]   ;;  %s4043_s11 = inlined_call_operand.vmem [shape: f32[1,32], index: 11, kind: input, shape index: {}]   ;;  %s4044_s12 = inlined_call_operand.hbm [shape: f32[32,32], index: 12, kind: input, shape index: {}]   ;;  %s4045_s13 = inlined_call_operand.vmem [shape: f32[1,32], index: 13, kind: input, shape index: {}]   ;;  %s4046_s14 = inlined_call_operand.hbm [shape: f32[32,32], index: 14, kind: input, shape index: {}]   ;;  %s4047_s15 = inlined_call_operand.vmem [shape: f32[1,32], index: 15, kind: input, shape index: {}]   ;;  %s4048_s16 = inlined_call_operand.vmem [shape: f32[1,32], index: 16, kind: input, shape index: {}]   ;;  %s4049_s17 = inlined_call_operand.vmem [shape: f32[1,32], index: 17, kind: input, shape index: {}]   ;;  %s4050_s18 = inlined_call_operand.hbm [shape: f32[8,32], index: 18, kind: output, shape index: {}]  }
   0x1   :  { %4061 = sst [smem:[#allocation22_spill]] %s4032_s0 }
   0x2   :  { %4062 = sst [smem:[#allocation23_spill]] %s4033_s1 }
   0x3   :  { %4063 = sst [smem:[#allocation24_spill]] %s4034_s2 }
   0x4   :  { %23 = vsyncpa [#allocation3], 0 }
   0x5   :  { %24 = vsyncpa [#allocation6], 0 }
   0x6   :  { %25 = vsyncpa [#allocation9], 0  ;;  %s52_s29 = sshll.u32 %s4038_s6, 4  ;;  %s53_s29 = int_to_ptr.hbm [resolvable:$true] %s52_s29 }
   0x7   :  { %26 = vsyncpa [#allocation4], 0  ;;  %s2925_s30 = smov [#allocation5]   ;;  %s86_s20 = sshll.u32 %s4044_s12, 4  ;;  %s87_s20 = int_to_ptr.hbm [resolvable:$true] %s86_s20 }
   0x8   :  { %s54_s0 = sshll.u32 %s2925_s30, 4  ;;  %s2926_s21 = smov 128   ;;  %s55_s0 = int_to_ptr.vmem [resolvable:$true] %s54_s0 }
   0x9   :  { %s2927_s22 = smov 8   ;;  %s2928_s2 = smov [#allocation8]  }
   0xa   :  { %60 = dma.hbm_to_vmem [thread:$0]  %s53_s29, 512, %s55_s0, [#allocation6], %s2926_s21, %s2926_s21, %s2927_s22  }
   0xb   :  { %s88_s23 = sshll.u32 %s2928_s2, 4  ;;  %s38_s26 = sshll.u32 %s4035_s3, 4  ;;  %s89_s23 = int_to_ptr.vmem [resolvable:$true] %s88_s23  ;;  %s39_s26 = int_to_ptr.hbm [resolvable:$true] %s38_s26 }
   0xc   :  { %94 = dma.hbm_to_vmem [thread:$0]  %s87_s20, 512, %s89_s23, [#allocation9], %s2926_s21, %s2926_s21, %s2927_s22  }
   0xd   :  { %s67_s28 = sshll.u32 %s4040_s8, 4  ;;  %s2929_s30 = smov [#allocation2]   ;;  %s68_s28 = int_to_ptr.hbm [resolvable:$true] %s67_s28 }
   0xe   :  { %s40_s19 = sshll.u32 %s2929_s30, 4  ;;  %s2930_s12 = smov [#allocation7]   ;;  %s41_s19 = int_to_ptr.vmem [resolvable:$true] %s40_s19 }
   0xf   :  { %43 = dma.hbm_to_vmem [thread:$0]  %s39_s26, 128, %s41_s19, [#allocation3]  }
  0x10   :  { %s69_s29 = sshll.u32 %s2930_s12, 4  ;;  %s101_s2 = sshll.u32 %s4046_s14, 4  ;;  %s70_s29 = int_to_ptr.vmem [resolvable:$true] %s69_s29  ;;  %s102_s2 = int_to_ptr.hbm [resolvable:$true] %s101_s2 }
  0x11   :  { %75 = dma.hbm_to_vmem [thread:$0]  %s68_s28, 512, %s70_s29, [#allocation6], %s2926_s21, %s2926_s21, %s2927_s22  }
  0x12   :  { %s2931_s3 = smov [#allocation10]  }
  0x13   :  { %s103_s20 = sshll.u32 %s2931_s3, 4  ;;  %s104_s20 = int_to_ptr.vmem [resolvable:$true] %s103_s20 }
  0x14   :  { %109 = dma.hbm_to_vmem [thread:$0]  %s102_s2, 512, %s104_s20, [#allocation9], %s2926_s21, %s2926_s21, %s2927_s22  }
  0x15   :  { %2917 = dma.done.wait [#allocation3], 128  }
  0x16   :  { %2918 = vsyncadd [#allocation3], 4294967168 }
  0x17   :  { %2919 = dma.done.wait [#allocation6], 1024  }
  0x18   :  { %2920 = vsyncadd [#allocation6], 4294966272 }
  0x19   :  { %2921 = dma.done.wait [#allocation9], 1024  }
  0x1a   :  { %2922 = vsyncadd [#allocation9], 4294966272  ;;  %v2932_v0 = vmov 0   ;;  %s4064_s23 = sld [smem:[#allocation23_spill]]  ;;  %v501_v4 = vld [vmem:[#allocation7 + $0x18] sm:$0xff]  ;;  %v500_v5 = vld [vmem:[#allocation7 + $0x10] sm:$0xff] }
  0x1b   :  { %2624 = vset.pattern.permute.xlu1 %v2932_v0  ;;  %2623 = vset.pattern.permute.xlu0 %v2932_v0  ;;  %v499_v6 = vld [vmem:[#allocation7 + $0x8] sm:$0xff]  ;;  %v498_v12 = vld [vmem:[#allocation7] sm:$0xff]  ;;  %s4065_s20 = sld [smem:[#allocation22_spill]]  ;;  %v152_v14 = vld [vmem:[#allocation2] sm:$0xff]  ;;  %vm211_vm0 = vcmask 261120   ;;  %v2933_v56 = vmov 32.0  }
  0x1c   :  { %2625 = vset.pattern.permute.xlu2 %v2932_v0  ;;  %542 = vmatpush.msra.mxu1 %v501_v4  ;;  %v420_v54 = vld [vmem:[#allocation5 + $0x18] sm:$0xff]  ;;  %v419_v55 = vld [vmem:[#allocation5 + $0x10] sm:$0xff]  ;;  %2671 = vrcp.f32 %v2933_v56  ;;  %v418_v57 = vld [vmem:[#allocation5 + $0x8] sm:$0xff]  ;;  %vm634_vm2 = vcmask 130048   ;;  %s4072_s14 = sld [smem:[#allocation24_spill]]  ;;  %s2937_s1 = smov 80  }
  0x1d   :  { %461 = vmatpush.msra.mxu0 %v420_v54  ;;  %v417_v58 = vld [vmem:[#allocation5] sm:$0xff]  ;;  %s2938_s2 = smov 16   ;;  %s2508_s21 = sshll.u32 %s4050_s18, 4  ;;  %s2509_s21 = int_to_ptr.hbm [resolvable:$true] %s2508_s21 }
  0x1e   :  { %543 = vmatpush.msra.mxu1 %v500_v5 }
  0x1f   :  { %462 = vmatpush.msra.mxu0 %v419_v55 }
  0x20   :  { %v138_v1 = vld [vmem:[%s4064_s23 + $0x10] sm:$0xff]  ;;  %v136_v2 = vld [vmem:[%s4064_s23] sm:$0xff]  ;;  %v139_v7 = vld [vmem:[%s4064_s23 + $0x18] sm:$0xff]  ;;  %544 = vmatpush.msra.mxu1 %v499_v6 }
  0x21   :  { %173 = vperm.xlu1 %2624, %v138_v1   ;;  %163 = vperm.xlu0 %2623, %v136_v2   ;;  %v140_v3 = vld [vmem:[%s4064_s23 + $0x20] sm:$0xff]  ;;  %v137_v8 = vld [vmem:[%s4064_s23 + $0x8] sm:$0xff]  ;;  %v142_v10 = vld [vmem:[%s4064_s23 + $0x30] sm:$0xff] }
  0x22   :  { %183 = vperm.xlu2 %2625, %v140_v3   ;;  %v141_v9 = vld [vmem:[%s4064_s23 + $0x28] sm:$0xff]  ;;  %v143_v11 = vld [vmem:[%s4064_s23 + $0x38] sm:$0xff]  ;;  %545 = vmatpush.msra.mxu1 %v498_v12  ;;  %v144_v13 = vld [vmem:[%s4065_s20] sm:$0xff]  ;;  %v2672_v59 = vpop.eup %2671 }
  0x23   :  { %v146_v15 = vld [vmem:[%s4065_s20 + $0x10] sm:$0xff]  ;;  %v153_v16 = vadd.f32 %v152_v14, %v144_v13  ;;  %v148_v18 = vld [vmem:[%s4065_s20 + $0x20] sm:$0xff]  ;;  %v145_v25 = vld [vmem:[%s4065_s20 + $0x8] sm:$0xff]  ;;  %463 = vmatpush.msra.mxu0 %v418_v57  ;;  %v237_v60 = vmul.f32 32.0, %v2672_v59  ;;  %vm241_vm1 = vweird.f32 %v2672_v59 }
  0x24   :  { %v155_v17 = vadd.f32 %v152_v14, %v146_v15  ;;  %v157_v23 = vadd.f32 %v152_v14, %v148_v18  ;;  %v154_v28 = vadd.f32 %v152_v14, %v145_v25  ;;  %v147_v30 = vld [vmem:[%s4065_s20 + $0x18] sm:$0xff]  ;;  %v149_v38 = vld [vmem:[%s4065_s20 + $0x28] sm:$0xff]  ;;  %v150_v46 = vld [vmem:[%s4065_s20 + $0x30] sm:$0xff] }
  0x25   :  { %v156_v35 = vadd.f32 %v152_v14, %v147_v30  ;;  %v158_v41 = vadd.f32 %v152_v14, %v149_v38  ;;  %v151_v43 = vld [vmem:[%s4065_s20 + $0x38] sm:$0xff]  ;;  %v159_v50 = vadd.f32 %v152_v14, %v150_v46  ;;  %464 = vmatpush.msra.mxu0 %v417_v58  ;;  %v238_v61 = vsub.f32 1.0, %v237_v60 }
  0x26   :  { %v160_v44 = vadd.f32 %v152_v14, %v151_v43 }
  0x27   :  { %v239_v62 = vmul.f32 %v2672_v59, %v238_v61 }
  0x29   :  { %178 = vperm.xlu1 %2624, %v139_v7   ;;  %168 = vperm.xlu0 %2623, %v137_v8   ;;  %v240_v63 = vadd.f32 %v2672_v59, %v239_v62 }
  0x2a   :  { %188 = vperm.xlu2 %2625, %v141_v9  }
  0x2b   :  { %v3173_v1 = vsel %vm241_vm1, %v2672_v59, %v240_v63 }
  0x2c   :  { %4066 = vst [vmem:[#allocation16_spill] sm:$0xff] %v3173_v1 }
  0x31   :  { %193 = vperm.xlu1 %2624, %v142_v10   ;;  %v3190_v10 = vld [vmem:[%s4041_s9] ss:$0 sm:$0xff]  ;;  %s2934_s9 = smov 96  }
  0x39   :  { %198 = vperm.xlu1 %2624, %v143_v11  }
  0x7c   :  { %v3096_v24 = vpop.permute.xlu2 %183 }
  0x7d   :  { %v3108_v29 = vmul.f32 %v3096_v24, %v157_v23 }
  0x7f   :  { %v224_v34 = vsel %vm211_vm0, %v3108_v29, 0.0 }
  0x84   :  { %v3136_v42 = vpop.permute.xlu2 %188 }
  0x85   :  { %v3144_v45 = vmul.f32 %v3136_v42, %v158_v41 }
  0x87   :  { %v227_v49 = vsel %vm211_vm0, %v3144_v45, 0.0 }
  0x93   :  { %v3086_v19 = vpop.permute.xlu1 %173  ;;  %v3088_v20 = vpop.permute.xlu0 %163 }
  0x94   :  { %v3091_v21 = vmul.f32 %v3088_v20, %v153_v16  ;;  %v3094_v22 = vmul.f32 %v3086_v19, %v155_v17 }
  0x96   :  { %2528 = vmatmul.msk.f32.vlgmr.msra.gmra.mxu1 %vm211_vm0, %v3091_v21  ;;  %v218_v26 = vsel %vm211_vm0, %v3094_v22, 0.0  ;;  %v212_v27 = vsel %vm211_vm0, %v3091_v21, 0.0 }
  0x97   :  { %219 = vadd.xlane.f32.xlu1 %v218_v26  ;;  %213 = vadd.xlane.f32.xlu0 %v212_v27 }
  0x9b   :  { %v3113_v31 = vpop.permute.xlu1 %178  ;;  %v3115_v32 = vpop.permute.xlu0 %168 }
  0x9c   :  { %v3118_v33 = vmul.f32 %v3115_v32, %v154_v28  ;;  %v3127_v37 = vmul.f32 %v3113_v31, %v156_v35 }
  0x9e   :  { %2529 = vmatmul.msk.f32.gmra.mxu1 %vm211_vm0, %v3118_v33  ;;  %v215_v36 = vsel %vm211_vm0, %v3118_v33, 0.0  ;;  %v221_v40 = vsel %vm211_vm0, %v3127_v37, 0.0 }
  0x9f   :  { %225 = vadd.xlane.f32.xlu0 %v224_v34  ;;  %216 = vadd.xlane.f32.xlu2 %v215_v36 }
  0xa3   :  { %v3132_v39 = vpop.permute.xlu1 %193 }
  0xa4   :  { %v3161_v52 = vmul.f32 %v3132_v39, %v159_v50 }
  0xa6   :  { %2530 = vmatmul.msk.f32.gmra.mxu1 %vm211_vm0, %v3094_v22  ;;  %v230_v53 = vsel %vm211_vm0, %v3161_v52, 0.0 }
  0xa7   :  { %222 = vadd.xlane.f32.xlu2 %v221_v40 }
  0xab   :  { %v3149_v47 = vpop.permute.xlu1 %198 }
  0xac   :  { %v3152_v48 = vmul.f32 %v3149_v47, %v160_v44 }
  0xae   :  { %2531 = vmatmul.msk.f32.gmra.mxu1 %vm211_vm0, %v3127_v37  ;;  %v233_v51 = vsel %vm211_vm0, %v3152_v48, 0.0 }
  0xaf   :  { %234 = vadd.xlane.f32.xlu1 %v233_v51  ;;  %228 = vadd.xlane.f32.xlu2 %v227_v49 }
  0xb6   :  { %2532 = vmatmul.msk.f32.gmra.mxu1 %vm211_vm0, %v3108_v29 }
  0xb7   :  { %231 = vadd.xlane.f32.xlu2 %v230_v53 }
  0xbe   :  { %2533 = vmatmul.msk.f32.gmra.mxu1 %vm211_vm0, %v3144_v45 }
  0xc6   :  { %2534 = vmatmul.msk.f32.gmra.mxu1 %vm211_vm0, %v3161_v52 }
  0xce   :  { %2535 = vmatmul.msk.f32.gmra.mxu1 %vm211_vm0, %v3152_v48 }
 0x10a   :  { %v220_v2 = vpop.xlane.xlu1 %219  ;;  %v214_v3 = vpop.xlane.xlu0 %213 }
 0x10b   :  { %v245_v4 = vmul.f32 %v3173_v1, %v220_v2  ;;  %v243_v5 = vmul.f32 %v3173_v1, %v214_v3 }
 0x10d   :  { %v3178_v6 = vsub.f32 %v3094_v22, %v245_v4  ;;  %v3181_v7 = vsub.f32 %v3091_v21, %v243_v5 }
 0x10f   :  { %v261_v8 = vmul.f32 %v3178_v6, %v3178_v6  ;;  %v259_v9 = vmul.f32 %v3181_v7, %v3181_v7 }
 0x111   :  { %v273_v11 = vsel %vm211_vm0, %v261_v8, 0.0  ;;  %v267_v12 = vsel %vm211_vm0, %v259_v9, 0.0 }
 0x112   :  { %274 = vadd.xlane.f32.xlu2 %v273_v11  ;;  %v217_v13 = vpop.xlane.xlu2 %216  ;;  %268 = vadd.xlane.f32.xlu0 %v267_v12  ;;  %v226_v14 = vpop.xlane.xlu0 %225 }
 0x113   :  { %v244_v15 = vmul.f32 %v3173_v1, %v217_v13  ;;  %v247_v16 = vmul.f32 %v3173_v1, %v226_v14  ;;  %v547_v17 = vpop.f32.mrf.mxu1 }
 0x114   :  { %v3197_v18 = vadd.f32 %v3190_v10, %v547_v17 }
 0x115   :  { %v3200_v21 = vsub.f32 %v3118_v33, %v244_v15  ;;  %v3203_v22 = vsub.f32 %v3108_v29, %v247_v16 }
 0x116   :  { %2536 = vmatpush.xpose.msk.msrb.mxu0 %vm634_vm2, %v3197_v18 }
 0x117   :  { %v260_v23 = vmul.f32 %v3200_v21, %v3200_v21  ;;  %v263_v25 = vmul.f32 %v3203_v22, %v3203_v22 }
 0x119   :  { %v270_v26 = vsel %vm211_vm0, %v260_v23, 0.0  ;;  %v279_v27 = vsel %vm211_vm0, %v263_v25, 0.0 }
 0x11a   :  { %v223_v28 = vpop.xlane.xlu2 %222  ;;  %271 = vadd.xlane.f32.xlu0 %v270_v26  ;;  %280 = vadd.xlane.f32.xlu1 %v279_v27 }
 0x11b   :  { %v246_v30 = vmul.f32 %v3173_v1, %v223_v28  ;;  %v550_v29 = vpop.f32.mrf.mxu1 }
 0x11c   :  { %v3215_v33 = vadd.f32 %v3190_v10, %v550_v29 }
 0x11d   :  { %v3218_v34 = vsub.f32 %v3127_v37, %v246_v30 }
 0x11e   :  { %2538 = vmatpush.xpose.msk.msrb.mxu1 %vm634_vm2, %v3215_v33  ;;  %v2626_v3 = vpack.i.bf16 %v3215_v33, %v3197_v18 }
 0x11f   :  { %v262_v35 = vmul.f32 %v3218_v34, %v3218_v34 }
 0x121   :  { %v276_v36 = vsel %vm211_vm0, %v262_v35, 0.0 }
 0x122   :  { %v235_v38 = vpop.xlane.xlu1 %234  ;;  %v229_v40 = vpop.xlane.xlu2 %228  ;;  %277 = vadd.xlane.f32.xlu0 %v276_v36 }
 0x123   :  { %v250_v41 = vmul.f32 %v3173_v1, %v235_v38  ;;  %v248_v43 = vmul.f32 %v3173_v1, %v229_v40  ;;  %v553_v44 = vpop.f32.mrf.mxu1 }
 0x124   :  { %v3228_v46 = vadd.f32 %v3190_v10, %v553_v44 }
 0x125   :  { %v3231_v37 = vsub.f32 %v3152_v48, %v250_v41  ;;  %v3234_v49 = vsub.f32 %v3144_v45, %v248_v43 }
 0x126   :  { %2540 = vmatpush.xpose.msk.msra.mxu2 %vm634_vm2, %v3228_v46 }
 0x127   :  { %v264_v50 = vmul.f32 %v3234_v49, %v3234_v49  ;;  %v266_v51 = vmul.f32 %v3231_v37, %v3231_v37 }
 0x129   :  { %v282_v53 = vsel %vm211_vm0, %v264_v50, 0.0  ;;  %v288_v54 = vsel %vm211_vm0, %v266_v51, 0.0 }
 0x12a   :  { %283 = vadd.xlane.f32.xlu2 %v282_v53  ;;  %v232_v55 = vpop.xlane.xlu2 %231  ;;  %289 = vadd.xlane.f32.xlu1 %v288_v54 }
 0x12b   :  { %v249_v48 = vmul.f32 %v3173_v1, %v232_v55  ;;  %v556_v45 = vpop.f32.mrf.mxu1 }
 0x12c   :  { %v3246_v56 = vadd.f32 %v3190_v10, %v556_v45  ;;  %v3295_v45 = vld [vmem:[%s4036_s4] ss:$0 sm:$0xff] }
 0x12d   :  { %v3249_v57 = vsub.f32 %v3161_v52, %v249_v48 }
 0x12e   :  { %2542 = vmatpush.xpose.msk.msra.mxu3 %vm634_vm2, %v3246_v56  ;;  %v2631_v63 = vpack.i.bf16 %v3246_v56, %v3228_v46 }
 0x12f   :  { %v265_v58 = vmul.f32 %v3249_v57, %v3249_v57 }
 0x131   :  { %v285_v59 = vsel %vm211_vm0, %v265_v58, 0.0 }
 0x132   :  { %286 = vadd.xlane.f32.xlu0 %v285_v59 }
 0x133   :  { %v559_v60 = vpop.f32.mrf.mxu1 }
 0x134   :  { %v3257_v61 = vadd.f32 %v3190_v10, %v559_v60 }
 0x136   :  { %2544 = vmatpush.xpose.msk.msrb.mxu2 %vm634_vm2, %v3257_v61 }
 0x13b   :  { %v562_v62 = vpop.f32.mrf.mxu1 }
 0x13c   :  { %v3262_v52 = vadd.f32 %v3190_v10, %v562_v62 }
 0x13e   :  { %2546 = vmatpush.xpose.msk.msrb.mxu3 %vm634_vm2, %v3262_v52  ;;  %v2636_v9 = vpack.i.bf16 %v3262_v52, %v3257_v61 }
 0x143   :  { %v565_v2 = vpop.f32.mrf.mxu1  ;;  %2632 = vrot.lane.b32.xlu1 %v2631_v63, %s2934_s9  ;;  %v3301_v63 = vld [vmem:[%s4037_s5] ss:$0 sm:$0xff] }
 0x144   :  { %v3271_v5 = vadd.f32 %v3190_v10, %v565_v2 }
 0x146   :  { %2627 = vrot.lane.b32.xlu0 %v2626_v3, %s2934_s9 }
 0x14b   :  { %v568_v4 = vpop.f32.mrf.mxu1 }
 0x14c   :  { %v3274_v8 = vadd.f32 %v3190_v10, %v568_v4 }
 0x14e   :  { %2637 = vrot.lane.b32.xlu0 %v2636_v9, %s2934_s9  ;;  %v2641_v11 = vpack.i.bf16 %v3274_v8, %v3271_v5 }
 0x150   :  { %2642 = vrot.lane.b32.xlu2 %v2641_v11, %s2934_s9  ;;  %s2936_s9 = smov 112  }
 0x185   :  { %v275_v12 = vpop.xlane.xlu2 %274  ;;  %v269_v13 = vpop.xlane.xlu0 %268 }
 0x186   :  { %v293_v14 = vmul.f32 %v275_v12, %v3173_v1  ;;  %v291_v15 = vmul.f32 %v269_v13, %v3173_v1 }
 0x188   :  { %v301_v16 = vadd.f32 1e-05, %v293_v14  ;;  %v299_v17 = vadd.f32 1e-05, %v291_v15 }
 0x18a   :  { %2673 = vrsqrt.f32 %v301_v16  ;;  %vm313_vm4 = vweird.f32 %v299_v17  ;;  %vm333_vm10 = vweird.f32 %v301_v16 }
 0x18b   :  { %2675 = vrsqrt.f32 %v299_v17 }
 0x18d   :  { %v281_v10 = vpop.xlane.xlu1 %280  ;;  %v272_v23 = vpop.xlane.xlu0 %271 }
 0x18e   :  { %v292_v25 = vmul.f32 %v272_v23, %v3173_v1  ;;  %v295_v27 = vmul.f32 %v281_v10, %v3173_v1 }
 0x190   :  { %v3283_v26 = vpop.eup %2673  ;;  %v300_v28 = vadd.f32 1e-05, %v292_v25  ;;  %v3287_v38 = vadd.f32 1e-05, %v295_v27 }
 0x191   :  { %v2676_v30 = vpop.eup %2675  ;;  %v328_v29 = vmul.f32 %v3283_v26, %v301_v16  ;;  %vm334_vm7 = vweird.f32 %v3283_v26 }
 0x192   :  { %v308_v35 = vmul.f32 %v2676_v30, %v299_v17  ;;  %2677 = vrsqrt.f32 %v300_v28  ;;  %vm314_vm3 = vweird.f32 %v2676_v30  ;;  %vm323_vm8 = vweird.f32 %v300_v28  ;;  %vm335_vm11 = vmor %vm333_vm10, %vm334_vm7 }
 0x193   :  { %v329_v41 = vmul.f32 %v3283_v26, %v328_v29  ;;  %2679 = vrsqrt.f32 %v3287_v38  ;;  %vm315_vm5 = vmor %vm313_vm4, %vm314_vm3  ;;  %vm353_vm1 = vweird.f32 %v3287_v38 }
 0x194   :  { %v309_v36 = vmul.f32 %v2676_v30, %v308_v35 }
 0x195   :  { %v278_v40 = vpop.xlane.xlu0 %277  ;;  %v330_v54 = vmul.f32 0.5, %v329_v41 }
 0x196   :  { %v310_v43 = vmul.f32 0.5, %v309_v36  ;;  %v294_v44 = vmul.f32 %v278_v40, %v3173_v1 }
 0x197   :  { %v331_v3 = vsub.f32 1.5, %v330_v54 }
 0x198   :  { %v311_v50 = vsub.f32 1.5, %v310_v43  ;;  %v302_v51 = vadd.f32 1e-05, %v294_v44  ;;  %v2678_v53 = vpop.eup %2677 }
 0x199   :  { %v318_v48 = vmul.f32 %v2678_v53, %v300_v28  ;;  %v3303_v2 = vpop.eup %2679  ;;  %vm324_vm6 = vweird.f32 %v2678_v53  ;;  %v332_v10 = vmul.f32 %v3283_v26, %v331_v3 }
 0x19a   :  { %v312_v55 = vmul.f32 %v2676_v30, %v311_v50  ;;  %2681 = vrsqrt.f32 %v302_v51  ;;  %vm325_vm9 = vmor %vm323_vm8, %vm324_vm6  ;;  %vm343_vm13 = vweird.f32 %v302_v51  ;;  %vm354_vm15 = vweird.f32 %v3303_v2 }
 0x19b   :  { %v319_v59 = vmul.f32 %v2678_v53, %v318_v48  ;;  %v336_v40 = vsel %vm335_vm11, %v3283_v26, %v332_v10  ;;  %vm355_vm3 = vmor %vm353_vm1, %vm354_vm15 }
 0x19c   :  { %v316_v58 = vsel %vm315_vm5, %v2676_v30, %v312_v55  ;;  %v389_v48 = vmul.f32 %v336_v40, %v3178_v6 }
 0x19d   :  { %v284_v60 = vpop.xlane.xlu2 %283  ;;  %v387_v62 = vmul.f32 %v316_v58, %v3181_v7  ;;  %v320_v4 = vmul.f32 0.5, %v319_v59  ;;  %v348_v7 = vmul.f32 %v3303_v2, %v3287_v38  ;;  %v290_v41 = vpop.xlane.xlu1 %289 }
 0x19e   :  { %v296_v9 = vmul.f32 %v284_v60, %v3173_v1  ;;  %v298_v16 = vmul.f32 %v290_v41, %v3173_v1  ;;  %v400_v59 = vmul.f32 %v3295_v45, %v389_v48 }
 0x19f   :  { %v398_v11 = vmul.f32 %v3295_v45, %v387_v62  ;;  %v321_v13 = vsub.f32 1.5, %v320_v4  ;;  %v349_v30 = vmul.f32 %v3303_v2, %v348_v7 }
 0x1a0   :  { %v2682_v12 = vpop.eup %2681  ;;  %v3307_v14 = vadd.f32 1e-05, %v296_v9  ;;  %v306_v26 = vadd.f32 1e-05, %v298_v16  ;;  %v3334_v6 = vadd.f32 %v3301_v63, %v400_v59 }
 0x1a1   :  { %v338_v15 = vmul.f32 %v2682_v12, %v302_v51  ;;  %v3313_v17 = vadd.f32 %v3301_v63, %v398_v11  ;;  %v322_v23 = vmul.f32 %v2678_v53, %v321_v13  ;;  %v350_v55 = vmul.f32 0.5, %v349_v30 }
 0x1a2   :  { %2683 = vrsqrt.f32 %v3307_v14  ;;  %vm344_vm12 = vweird.f32 %v2682_v12  ;;  %4068 = vst [vmem:[#allocation18_spill] sm:$0xff] %v3334_v6  ;;  %vm363_vm5 = vweird.f32 %v3307_v14  ;;  %vm383_vm11 = vweird.f32 %v306_v26 }
 0x1a3   :  { %v339_v25 = vmul.f32 %v2682_v12, %v338_v15  ;;  %2520 = vmatmul.msk.f32.vlgmr.msra.gmra.mxu0 %vm211_vm0, %v3313_v17  ;;  %v326_v27 = vsel %vm325_vm9, %v2678_v53, %v322_v23  ;;  %vm345_vm14 = vmor %vm343_vm13, %vm344_vm12  ;;  %v351_v60 = vsub.f32 1.5, %v350_v55 }
 0x1a4   :  { %v388_v36 = vmul.f32 %v326_v27, %v3200_v21 }
 0x1a5   :  { %v340_v29 = vmul.f32 0.5, %v339_v25  ;;  %v287_v35 = vpop.xlane.xlu0 %286  ;;  %v352_v11 = vmul.f32 %v3303_v2, %v351_v60 }
 0x1a6   :  { %v297_v28 = vmul.f32 %v287_v35, %v3173_v1  ;;  %v399_v44 = vmul.f32 %v3295_v45, %v388_v36 }
 0x1a7   :  { %v341_v43 = vsub.f32 1.5, %v340_v29  ;;  %v356_v7 = vsel %vm355_vm3, %v3303_v2, %v352_v11 }
 0x1a8   :  { %v2684_v50 = vpop.eup %2683  ;;  %v305_v54 = vadd.f32 1e-05, %v297_v28  ;;  %v3326_v53 = vadd.f32 %v3301_v63, %v399_v44  ;;  %v391_v25 = vmul.f32 %v356_v7, %v3203_v22 }
 0x1a9   :  { %v342_v58 = vmul.f32 %v2682_v12, %v341_v43  ;;  %v358_v21 = vmul.f32 %v2684_v50, %v3307_v14  ;;  %vm364_vm4 = vweird.f32 %v2684_v50 }
 0x1aa   :  { %4067 = vst [vmem:[#allocation17_spill] sm:$0xff] %v3326_v53  ;;  %2685 = vrsqrt.f32 %v305_v54  ;;  %vm365_vm6 = vmor %vm363_vm5, %vm364_vm4  ;;  %v402_v38 = vmul.f32 %v3295_v45, %v391_v25  ;;  %vm373_vm8 = vweird.f32 %v305_v54  ;;  %vm843_vm4 = vcmask 64512  }
 0x1ab   :  { %2521 = vmatmul.msk.f32.gmra.mxu0 %vm211_vm0, %v3326_v53  ;;  %v346_v62 = vsel %vm345_vm14, %v2682_v12, %v342_v58  ;;  %v359_v3 = vmul.f32 %v2684_v50, %v358_v21  ;;  %2687 = vrsqrt.f32 %v306_v26 }
 0x1ac   :  { %v390_v9 = vmul.f32 %v346_v62, %v3218_v34  ;;  %v3353_v40 = vadd.f32 %v3301_v63, %v402_v38 }
 0x1ad   :  { %v360_v13 = vmul.f32 0.5, %v359_v3 }
 0x1ae   :  { %v401_v12 = vmul.f32 %v3295_v45, %v390_v9 }
 0x1af   :  { %v361_v15 = vsub.f32 1.5, %v360_v13 }
 0x1b0   :  { %v2686_v4 = vpop.eup %2685  ;;  %v3345_v34 = vadd.f32 %v3301_v63, %v401_v12 }
 0x1b1   :  { %v368_v51 = vmul.f32 %v2686_v4, %v305_v54  ;;  %v2688_v23 = vpop.eup %2687  ;;  %v362_v27 = vmul.f32 %v2684_v50, %v361_v15  ;;  %vm374_vm7 = vweird.f32 %v2686_v4 }
 0x1b2   :  { %v378_v30 = vmul.f32 %v2688_v23, %v306_v26  ;;  %vm375_vm9 = vmor %vm373_vm8, %vm374_vm7  ;;  %vm384_vm10 = vweird.f32 %v2688_v23  ;;  %v2664_v26 = vld [vmem:[%s4039_s7] ss:$0 sm:$0xff] }
 0x1b3   :  { %2522 = vmatmul.msk.f32.gmra.mxu0 %vm211_vm0, %v3334_v6  ;;  %v369_v10 = vmul.f32 %v2686_v4, %v368_v51  ;;  %v366_v2 = vsel %vm365_vm6, %v2684_v50, %v362_v27  ;;  %vm385_vm12 = vmor %vm383_vm11, %vm384_vm10 }
 0x1b4   :  { %v379_v35 = vmul.f32 %v2688_v23, %v378_v30  ;;  %v392_v22 = vmul.f32 %v366_v2, %v3234_v49 }
 0x1b5   :  { %v370_v29 = vmul.f32 0.5, %v369_v10  ;;  %v2633_v2 = vpop.permute.xlu1 %2632 }
 0x1b6   :  { %v380_v41 = vmul.f32 0.5, %v379_v35  ;;  %v403_v14 = vmul.f32 %v3295_v45, %v392_v22  ;;  %v2634_v22 = vunpack.i.l.bf16 %v2633_v2 }
 0x1b7   :  { %v371_v36 = vsub.f32 1.5, %v370_v29 }
 0x1b8   :  { %v381_v43 = vsub.f32 1.5, %v380_v41  ;;  %v3360_v50 = vadd.f32 %v3301_v63, %v403_v14  ;;  %v2628_v7 = vpop.permute.xlu0 %2627 }
 0x1b9   :  { %v372_v28 = vmul.f32 %v2686_v4, %v371_v36  ;;  %v2630_v29 = vunpack.i.h.bf16 %v2628_v7 }
 0x1ba   :  { %4069 = vst [vmem:[#allocation19_spill] sm:$0xff] %v3360_v50  ;;  %v382_v16 = vmul.f32 %v2688_v23, %v381_v43  ;;  %v2635_v43 = vunpack.i.h.bf16 %v2633_v2  ;;  %v575_v2 = vld [vmem:[%s4072_s14 + $0x4] sm:$0x1] }
 0x1bb   :  { %2523 = vmatmul.msk.f32.gmra.mxu0 %vm211_vm0, %v3345_v34  ;;  %v376_v44 = vsel %vm375_vm9, %v2686_v4, %v372_v28  ;;  %vm583_vm11 = vcmp.gt.f32.partialorder %v575_v2, 0.0 }
 0x1bc   :  { %v393_v55 = vmul.f32 %v376_v44, %v3249_v57  ;;  %v386_v54 = vsel %vm385_vm12, %v2688_v23, %v382_v16  ;;  %v2629_v23 = vunpack.i.l.bf16 %v2628_v7  ;;  %v571_v44 = vld [vmem:[%s4072_s14] sm:$0x1] }
 0x1bd   :  { %v394_v58 = vmul.f32 %v386_v54, %v3231_v37  ;;  %vm579_vm13 = vcmp.gt.f32.partialorder %v571_v44, 0.0 }
 0x1be   :  { %v404_v49 = vmul.f32 %v3295_v45, %v393_v55  ;;  %v587_v55 = vlaneseq  ;;  %v592_v16 = vsel %vm579_vm13, 1, %v2932_v0 }
 0x1bf   :  { %v405_v57 = vmul.f32 %v3295_v45, %v394_v58 }
 0x1c0   :  { %v3367_v48 = vadd.f32 %v3301_v63, %v404_v49  ;;  %v572_v49 = vld [vmem:[%s4072_s14 + $0x1] sm:$0x1]  ;;  %v588_v54 = vshrl.u32 %v587_v55, 7  ;;  %v590_v58 = vand.u32 127, %v587_v55  ;;  %v576_v55 = vld [vmem:[%s4072_s14 + $0x5] sm:$0x1] }
 0x1c1   :  { %v3374_v21 = vadd.f32 %v3301_v63, %v405_v57  ;;  %v600_v57 = vperm.slane %v592_v16, 0  ;;  %vm580_vm14 = vcmp.gt.f32.partialorder %v572_v49, 0.0 }
 0x1c2   :  { %4070 = vst [vmem:[#allocation20_spill] sm:$0xff] %v3367_v48  ;;  %vm3424_vm15 = vcmp.ge.s32.totalorder %v588_v54, %v590_v58 }
 0x1c3   :  { %2524 = vmatmul.msk.f32.gmra.mxu0 %vm211_vm0, %v3353_v40  ;;  %4071 = vst [vmem:[#allocation21_spill] sm:$0xff] %v3374_v21  ;;  %vm608_vm1 = vcmp.eq.s32.totalorder %v600_v57, 1 }
 0x1c4   :  { %vm618_vm3 = vmand %vm608_vm1, %vm3424_vm15 }
 0x1cb   :  { %2525 = vmatmul.msk.f32.gmra.mxu0 %vm211_vm0, %v3360_v50 }
 0x1d3   :  { %2526 = vmatmul.msk.f32.gmra.mxu0 %vm211_vm0, %v3367_v48 }
 0x1db   :  { %2527 = vmatmul.msk.f32.gmra.mxu0 %vm211_vm0, %v3374_v21 }
 0x220   :  { %v466_v59 = vpop.f32.mrf.mxu0 }
 0x221   :  { %v467_v60 = vadd.f32 %v2664_v26, %v466_v59  ;;  %v593_v59 = vsel %vm580_vm14, 1, %v2932_v0  ;;  %vm584_vm14 = vcmp.gt.f32.partialorder %v576_v55, 0.0 }
 0x222   :  { %v597_v57 = vsel %vm584_vm14, 1, %v2932_v0 }
 0x223   :  { %v3381_v62 = vmul.f32 0.17677669, %v467_v60  ;;  %v601_v60 = vperm.slane %v593_v59, 0 }
 0x225   :  { %2537 = vmatmul.msk.f32.vlgmr.msrb.gmra.mxu0 %vm634_vm2, %v3381_v62  ;;  %vm609_vm5 = vcmp.eq.s32.totalorder %v601_v60, 1  ;;  %v577_v60 = vld [vmem:[%s4072_s14 + $0x6] sm:$0x1] }
 0x226   :  { %vm619_vm6 = vmand %vm609_vm5, %vm3424_vm15  ;;  %vm585_vm5 = vcmp.gt.f32.partialorder %v577_v60, 0.0 }
 0x228   :  { %v469_v37 = vpop.f32.mrf.mxu0 }
 0x229   :  { %v470_v3 = vadd.f32 %v2664_v26, %v469_v37  ;;  %v2935_v37 = vmov -4.2949673e+09  }
 0x22b   :  { %v3385_v45 = vmul.f32 0.17677669, %v470_v3  ;;  %v3432_v3 = vsel %vm618_vm3, 0.0, %v2935_v37 }
 0x22d   :  { %2539 = vmatmul.msk.f32.vlgmr.msrb.gmra.mxu1 %vm634_vm2, %v3385_v45 }
 0x230   :  { %v472_v63 = vpop.f32.mrf.mxu0 }
 0x231   :  { %v473_v4 = vadd.f32 %v2664_v26, %v472_v63 }
 0x233   :  { %v3389_v9 = vmul.f32 0.17677669, %v473_v4 }
 0x235   :  { %2541 = vmatmul.msk.f32.vlgmr.msra.gmra.mxu2 %vm634_vm2, %v3389_v9 }
 0x236   :  { %2548 = vmatpush.xpose.msk.msra.mxu2 %vm634_vm2, %v3271_v5 }
 0x238   :  { %v475_v11 = vpop.f32.mrf.mxu0 }
 0x239   :  { %v476_v13 = vadd.f32 %v2664_v26, %v475_v11  ;;  %v573_v11 = vld [vmem:[%s4072_s14 + $0x2] sm:$0x1] }
 0x23a   :  { %vm581_vm7 = vcmp.gt.f32.partialorder %v573_v11, 0.0 }
 0x23b   :  { %v3395_v51 = vmul.f32 0.17677669, %v476_v13  ;;  %v594_v7 = vsel %vm581_vm7, 1, %v2932_v0 }
 0x23d   :  { %2543 = vmatmul.msk.f32.vlgmr.msra.gmra.mxu3 %vm634_vm2, %v3395_v51 }
 0x23e   :  { %2550 = vmatpush.xpose.msk.msra.mxu3 %vm634_vm2, %v3274_v8 }
 0x240   :  { %v478_v12 = vpop.f32.mrf.mxu0 }
 0x241   :  { %v479_v15 = vadd.f32 %v2664_v26, %v478_v12  ;;  %v3445_v12 = vsel %vm619_vm6, 0.0, %v2935_v37 }
 0x243   :  { %v3401_v10 = vmul.f32 0.17677669, %v479_v15 }
 0x245   :  { %2545 = vmatmul.msk.f32.vlgmr.msrb.gmra.mxu2 %vm634_vm2, %v3401_v10 }
 0x246   :  { %1065 = vmatpush.msrb.mxu2 %v2629_v23 }
 0x248   :  { %v481_v25 = vpop.f32.mrf.mxu0 }
 0x249   :  { %v482_v27 = vadd.f32 %v2664_v26, %v481_v25  ;;  %v574_v25 = vld [vmem:[%s4072_s14 + $0x3] sm:$0x1] }
 0x24a   :  { %vm582_vm8 = vcmp.gt.f32.partialorder %v574_v25, 0.0 }
 0x24b   :  { %v3405_v30 = vmul.f32 0.17677669, %v482_v27  ;;  %v602_v27 = vperm.slane %v594_v7, 0 }
 0x24d   :  { %2547 = vmatmul.msk.f32.vlgmr.msrb.gmra.mxu3 %vm634_vm2, %v3405_v30  ;;  %vm610_vm9 = vcmp.eq.s32.totalorder %v602_v27, 1  ;;  %v578_v27 = vld [vmem:[%s4072_s14 + $0x7] sm:$0x1] }
 0x24e   :  { %1091 = vmatpush.msrb.mxu3 %v2630_v29  ;;  %vm620_vm10 = vmand %vm610_vm9, %vm3424_vm15 }
 0x250   :  { %v484_v38 = vpop.f32.mrf.mxu0 }
 0x251   :  { %v485_v35 = vadd.f32 %v2664_v26, %v484_v38  ;;  %v595_v38 = vsel %vm582_vm8, 1, %v2932_v0  ;;  %vm586_vm8 = vcmp.gt.f32.partialorder %v578_v27, 0.0 }
 0x253   :  { %v3409_v36 = vmul.f32 0.17677669, %v485_v35  ;;  %v603_v35 = vperm.slane %v595_v38, 0 }
 0x255   :  { %2549 = vmatmul.msk.f32.vlgmr.msra.gmra.mxu2 %vm634_vm2, %v3409_v36  ;;  %vm611_vm12 = vcmp.eq.s32.totalorder %v603_v35, 1 }
 0x256   :  { %1117 = vmatpush.msra.mxu2 %v2634_v22  ;;  %v3463_v22 = vsel %vm620_vm10, 0.0, %v2935_v37  ;;  %vm621_vm13 = vmand %vm611_vm12, %vm3424_vm15 }
 0x257   :  { %v3477_v49 = vsel %vm621_vm13, 0.0, %v2935_v37 }
 0x258   :  { %v487_v41 = vpop.f32.mrf.mxu0 }
 0x259   :  { %v488_v28 = vadd.f32 %v2664_v26, %v487_v41  ;;  %v3530_v26 = vpop.permute.xlu0 %2637 }
 0x25b   :  { %v3413_v14 = vmul.f32 0.17677669, %v488_v28 }
 0x25d   :  { %2551 = vmatmul.msk.f32.vlgmr.msra.gmra.mxu3 %vm634_vm2, %v3413_v14 }
 0x25e   :  { %1143 = vmatpush.msra.mxu3 %v2635_v43  ;;  %v596_v43 = vsel %vm583_vm11, 1, %v2932_v0 }
 0x25f   :  { %v604_v16 = vperm.slane %v596_v43, 0 }
 0x261   :  { %vm612_vm1 = vcmp.eq.s32.totalorder %v604_v16, 1 }
 0x262   :  { %vm622_vm3 = vmand %vm612_vm1, %vm3424_vm15 }
 0x263   :  { %v3491_v11 = vsel %vm622_vm3, 0.0, %v2935_v37 }
 0x2a2   :  { %v658_v63 = vpop.f32.mrf.mxu0 }
 0x2a3   :  { %v3435_v4 = vadd.f32 %v658_v63, %v3432_v3  ;;  %v605_v63 = vperm.slane %v597_v57, 0 }
 0x2a5   :  { %v844_v13 = vsel %vm843_vm4, %v3435_v4, -inf  ;;  %vm613_vm6 = vcmp.eq.s32.totalorder %v605_v63, 1 }
 0x2a6   :  { %845 = vmax.xlane.f32.xlu2 %v844_v13  ;;  %vm623_vm7 = vmand %vm613_vm6, %vm3424_vm15 }
 0x2a7   :  { %v3505_v38 = vsel %vm623_vm7, 0.0, %v2935_v37 }
 0x2aa   :  { %v684_v15 = vpop.f32.mrf.mxu1 }
 0x2ab   :  { %v3449_v23 = vadd.f32 %v684_v15, %v3445_v12  ;;  %v598_v15 = vsel %vm585_vm5, 1, %v2932_v0 }
 0x2ad   :  { %v847_v29 = vsel %vm843_vm4, %v3449_v23, -inf }
 0x2ae   :  { %848 = vmax.xlane.f32.xlu0 %v847_v29  ;;  %v606_v29 = vperm.slane %v598_v15, 0 }
 0x2b0   :  { %vm614_vm9 = vcmp.eq.s32.totalorder %v606_v29, 1 }
 0x2b1   :  { %vm624_vm10 = vmand %vm614_vm9, %vm3424_vm15 }
 0x2b2   :  { %v3513_v55 = vsel %vm624_vm10, 0.0, %v2935_v37 }
 0x2b8   :  { %v710_v41 = vpop.f32.mrf.mxu2 }
 0x2b9   :  { %v3466_v28 = vadd.f32 %v710_v41, %v3463_v22  ;;  %v599_v41 = vsel %vm586_vm8, 1, %v2932_v0 }
 0x2bb   :  { %v850_v44 = vsel %vm843_vm4, %v3466_v28, -inf }
 0x2bc   :  { %851 = vmax.xlane.f32.xlu1 %v850_v44  ;;  %v607_v44 = vperm.slane %v599_v41, 0 }
 0x2be   :  { %vm615_vm11 = vcmp.eq.s32.totalorder %v607_v44, 1 }
 0x2bf   :  { %vm625_vm12 = vmand %vm615_vm11, %vm3424_vm15 }
 0x2c0   :  { %v736_v54 = vpop.f32.mrf.mxu3  ;;  %v3520_v0 = vsel %vm625_vm12, 0.0, %v2935_v37 }
 0x2c1   :  { %v3480_v58 = vadd.f32 %v736_v54, %v3477_v49 }
 0x2c3   :  { %v853_v59 = vsel %vm843_vm4, %v3480_v58, -inf }
 0x2c4   :  { %854 = vmax.xlane.f32.xlu2 %v853_v59 }
 0x2c8   :  { %v762_v13 = vpop.f32.mrf.mxu2 }
 0x2c9   :  { %v3494_v7 = vadd.f32 %v762_v13, %v3491_v11  ;;  %v3528_v13 = vpop.permute.xlu2 %2642 }
 0x2cb   :  { %v856_v25 = vsel %vm843_vm4, %v3494_v7, -inf }
 0x2cc   :  { %857 = vmax.xlane.f32.xlu0 %v856_v25 }
 0x2d0   :  { %v788_v2 = vpop.f32.mrf.mxu3 }
 0x2d1   :  { %v789_v35 = vadd.f32 %v788_v2, %v3505_v38 }
 0x2d3   :  { %v859_v43 = vsel %vm843_vm4, %v789_v35, -inf }
 0x2d4   :  { %860 = vmax.xlane.f32.xlu1 %v859_v43 }
 0x2d8   :  { %v814_v16 = vpop.f32.mrf.mxu2 }
 0x2d9   :  { %v815_v54 = vadd.f32 %v814_v16, %v3513_v55 }
 0x2db   :  { %v862_v57 = vsel %vm843_vm4, %v815_v54, -inf }
 0x2dc   :  { %863 = vmax.xlane.f32.xlu2 %v862_v57 }
 0x2e0   :  { %v840_v59 = vpop.f32.mrf.mxu3 }
 0x2e1   :  { %v841_v60 = vadd.f32 %v840_v59, %v3520_v0 }
 0x2e3   :  { %v865_v63 = vsel %vm843_vm4, %v841_v60, -inf }
 0x2e4   :  { %866 = vmax.xlane.f32.xlu0 %v865_v63 }
 0x2ed   :  { %1252 = vrot.lane.b32.xlu1 %v3381_v62, %s2936_s9 }
 0x2f8   :  { %1254 = vrot.lane.b32.xlu0 %v3197_v18, %s2936_s9 }
 0x319   :  { %v846_v15 = vpop.xlane.xlu2 %845 }
 0x31a   :  { %v868_v37 = vsub.f32 %v3435_v4, %v846_v15 }
 0x31c   :  { %v876_v25 = vmul.f32 1.442695, %v868_v37 }
 0x31e   :  { %2689 = vpow2.f32 %v876_v25 }
 0x321   :  { %v849_v27 = vpop.xlane.xlu0 %848 }
 0x322   :  { %v869_v29 = vsub.f32 %v3449_v23, %v849_v27 }
 0x324   :  { %v3534_v2 = vpop.eup %2689  ;;  %v878_v41 = vmul.f32 1.442695, %v869_v29 }
 0x325   :  { %v892_v62 = vsel %vm843_vm4, %v3534_v2, 0.0 }
 0x326   :  { %2691 = vpow2.f32 %v878_v41  ;;  %893 = vadd.xlane.f32.xlu1 %v892_v62 }
 0x32c   :  { %v3538_v43 = vpop.eup %2691 }
 0x32d   :  { %v895_v44 = vsel %vm843_vm4, %v3538_v43, 0.0 }
 0x32e   :  { %896 = vadd.xlane.f32.xlu2 %v895_v44 }
 0x32f   :  { %v852_v4 = vpop.xlane.xlu1 %851 }
 0x330   :  { %v870_v16 = vsub.f32 %v3466_v28, %v852_v4 }
 0x332   :  { %v880_v57 = vmul.f32 1.442695, %v870_v16 }
 0x334   :  { %2693 = vpow2.f32 %v880_v57 }
 0x337   :  { %v855_v63 = vpop.xlane.xlu2 %854 }
 0x338   :  { %v871_v28 = vsub.f32 %v3480_v58, %v855_v63 }
 0x33a   :  { %v3543_v23 = vpop.eup %2693  ;;  %v882_v37 = vmul.f32 1.442695, %v871_v28 }
 0x33b   :  { %v898_v59 = vsel %vm843_vm4, %v3543_v23, 0.0 }
 0x33c   :  { %899 = vadd.xlane.f32.xlu0 %v898_v59  ;;  %2695 = vpow2.f32 %v882_v37 }
 0x33f   :  { %1366 = vrot.lane.b32.xlu1 %v3257_v61, %s2936_s9  ;;  %v858_v15 = vpop.xlane.xlu0 %857 }
 0x340   :  { %v872_v27 = vsub.f32 %v3494_v7, %v858_v15 }
 0x342   :  { %v3559_v44 = vpop.eup %2695 }
 0x346   :  { %1364 = vrot.lane.b32.xlu2 %v3401_v10, %s2936_s9  ;;  %v884_v10 = vmul.f32 1.442695, %v872_v27 }
 0x347   :  { %v861_v25 = vpop.xlane.xlu1 %860 }
 0x348   :  { %v873_v29 = vsub.f32 %v789_v35, %v861_v25  ;;  %2697 = vpow2.f32 %v884_v10 }
 0x34a   :  { %v886_v62 = vmul.f32 1.442695, %v873_v29 }
 0x34c   :  { %2699 = vpow2.f32 %v886_v62 }
 0x34e   :  { %v3565_v4 = vpop.eup %2697 }
 0x34f   :  { %v864_v41 = vpop.xlane.xlu2 %863  ;;  %v904_v57 = vsel %vm843_vm4, %v3565_v4, 0.0 }
 0x350   :  { %1282 = vrot.lane.b32.xlu0 %v3215_v33, %s2936_s9  ;;  %v874_v58 = vsub.f32 %v815_v54, %v864_v41 }
 0x352   :  { %v888_v7 = vmul.f32 1.442695, %v874_v58 }
 0x354   :  { %2701 = vpow2.f32 %v888_v7 }
 0x357   :  { %v867_v35 = vpop.xlane.xlu0 %866 }
 0x358   :  { %1280 = vrot.lane.b32.xlu0 %v3385_v45, %s2936_s9  ;;  %v901_v45 = vsel %vm843_vm4, %v3559_v44, 0.0  ;;  %v875_v16 = vsub.f32 %v841_v60, %v867_v35 }
 0x35a   :  { %v890_v59 = vmul.f32 1.442695, %v875_v16 }
 0x35c   :  { %2703 = vpow2.f32 %v890_v59 }
 0x360   :  { %1336 = vrot.lane.b32.xlu0 %v3395_v51, %s2936_s9  ;;  %v3567_v51 = vpop.eup %2699 }
 0x361   :  { %v907_v54 = vsel %vm843_vm4, %v3567_v51, 0.0  ;;  %v3575_v63 = vpop.eup %2701 }
 0x362   :  { %v910_v28 = vsel %vm843_vm4, %v3575_v63, 0.0  ;;  %v3579_v60 = vpop.eup %2703 }
 0x363   :  { %v913_v15 = vsel %vm843_vm4, %v3579_v60, 0.0 }
 0x368   :  { %1310 = vrot.lane.b32.xlu0 %v3228_v46, %s2936_s9 }
 0x369   :  { %902 = vadd.xlane.f32.xlu1 %v901_v45 }
 0x36a   :  { %v3597_v58 = vpop.permute.xlu0 %1254 }
 0x36f   :  { %905 = vadd.xlane.f32.xlu2 %v904_v57 }
 0x370   :  { %1420 = vrot.lane.b32.xlu0 %v3409_v36, %s2936_s9  ;;  %v3585_v36 = vpop.permute.xlu1 %1252 }
 0x371   :  { %908 = vadd.xlane.f32.xlu1 %v907_v54 }
 0x377   :  { %911 = vadd.xlane.f32.xlu2 %v910_v28 }
 0x37f   :  { %914 = vadd.xlane.f32.xlu2 %v913_v15 }
 0x38a   :  { %1338 = vrot.lane.b32.xlu1 %v3246_v56, %s2936_s9 }
 0x392   :  { %1392 = vrot.lane.b32.xlu1 %v3405_v30, %s2936_s9 }
 0x397   :  { %1394 = vrot.lane.b32.xlu2 %v3262_v52, %s2936_s9 }
 0x399   :  { %v894_v37 = vpop.xlane.xlu1 %893 }
 0x39a   :  { %2705 = vrcp.f32 %v894_v37  ;;  %1422 = vrot.lane.b32.xlu1 %v3271_v5, %s2936_s9  ;;  %v927_v30 = vand.u32 2147483648, %v894_v37  ;;  %v925_v62 = vand.u32 2147483647, %v894_v37  ;;  %vm921_vm13 = vweird.f32 %v894_v37 }
 0x39c   :  { %v928_v7 = vor.u32 1.1754944e-38, %v927_v30  ;;  %vm926_vm1 = vcmp.eq.f32.partialorder %v925_v62, 8.507059e+37 }
 0x39f   :  { %1308 = vrot.lane.b32.xlu2 %v3389_v9, %s2936_s9 }
 0x3a0   :  { %v2706_v25 = vpop.eup %2705 }
 0x3a1   :  { %v917_v27 = vmul.f32 %v2706_v25, %v894_v37  ;;  %v897_v29 = vpop.xlane.xlu2 %896  ;;  %vm922_vm15 = vweird.f32 %v2706_v25  ;;  %v2639_v37 = vunpack.i.l.bf16 %v3530_v26 }
 0x3a2   :  { %2707 = vrcp.f32 %v897_v29  ;;  %1448 = vrot.lane.b32.xlu1 %v3413_v14, %s2936_s9  ;;  %vm923_vm14 = vmor %vm921_vm13, %vm922_vm15  ;;  %v942_v59 = vand.u32 2147483648, %v897_v29  ;;  %v940_v15 = vand.u32 2147483647, %v897_v29  ;;  %vm936_vm5 = vweird.f32 %v897_v29 }
 0x3a3   :  { %v918_v10 = vsub.f32 1.0, %v917_v27 }
 0x3a4   :  { %vm941_vm7 = vcmp.eq.f32.partialorder %v940_v15, 8.507059e+37 }
 0x3a5   :  { %v919_v41 = vmul.f32 %v2706_v25, %v918_v10 }
 0x3a7   :  { %v920_v45 = vadd.f32 %v2706_v25, %v919_v41  ;;  %1450 = vrot.lane.b32.xlu2 %v3274_v8, %s2936_s9 }
 0x3a8   :  { %v2708_v9 = vpop.eup %2707 }
 0x3a9   :  { %v924_v35 = vsel %vm923_vm14, %v2706_v25, %v920_v45  ;;  %v932_v16 = vmul.f32 %v2708_v9, %v897_v29  ;;  %vm937_vm3 = vweird.f32 %v2708_v9  ;;  %v943_v25 = vor.u32 1.1754944e-38, %v942_v59 }
 0x3aa   :  { %v929_v57 = vsel %vm926_vm1, %v928_v7, %v924_v35  ;;  %vm938_vm6 = vmor %vm936_vm5, %vm937_vm3  ;;  %v2640_v35 = vunpack.i.h.bf16 %v3530_v26 }
 0x3ab   :  { %v930_v14 = vmul.f32 %v3534_v2, %v929_v57  ;;  %v933_v54 = vsub.f32 1.0, %v932_v16 }
 0x3ad   :  { %v934_v28 = vmul.f32 %v2708_v9, %v933_v54  ;;  %v1036_v27 = vmul.f32 %v930_v14, %v3088_v20 }
 0x3af   :  { %v935_v10 = vadd.f32 %v2708_v9, %v934_v28  ;;  %v900_v41 = vpop.xlane.xlu0 %899  ;;  %2552 = vmatmul.msk.f32.vlgmr.msrb.gmra.mxu2 %vm843_vm4, %v1036_v27 }
 0x3b0   :  { %2709 = vrcp.f32 %v900_v41  ;;  %1169 = vmatpush.msrb.mxu2 %v2639_v37  ;;  %v957_v57 = vand.u32 2147483648, %v900_v41  ;;  %v955_v54 = vand.u32 2147483647, %v900_v41  ;;  %vm951_vm9 = vweird.f32 %v900_v41 }
 0x3b1   :  { %v939_v30 = vsel %vm938_vm6, %v2708_v9, %v935_v10  ;;  %v2644_v37 = vunpack.i.l.bf16 %v3528_v13 }
 0x3b2   :  { %v944_v2 = vsel %vm941_vm7, %v943_v25, %v939_v30  ;;  %v958_v9 = vor.u32 1.1754944e-38, %v957_v57  ;;  %vm956_vm11 = vcmp.eq.f32.partialorder %v955_v54, 8.507059e+37  ;;  %v3621_v30 = vpop.permute.xlu2 %1364 }
 0x3b3   :  { %v945_v62 = vmul.f32 %v3538_v43, %v944_v2 }
 0x3b5   :  { %v1037_v45 = vmul.f32 %v945_v62, %v3115_v32 }
 0x3b6   :  { %v2710_v7 = vpop.eup %2709 }
 0x3b7   :  { %v947_v16 = vmul.f32 %v2710_v7, %v900_v41  ;;  %2553 = vmatmul.msk.f32.vlgmr.msrb.gmra.mxu3 %vm843_vm4, %v1037_v45  ;;  %vm952_vm8 = vweird.f32 %v2710_v7  ;;  %v3619_v41 = vpop.permute.xlu1 %1366 }
 0x3b8   :  { %1195 = vmatpush.msrb.mxu3 %v2640_v35  ;;  %vm953_vm10 = vmor %vm951_vm9, %vm952_vm8 }
 0x3b9   :  { %v948_v29 = vsub.f32 1.0, %v947_v16 }
 0x3bb   :  { %v949_v14 = vmul.f32 %v2710_v7, %v948_v29 }
 0x3bd   :  { %v950_v59 = vadd.f32 %v2710_v7, %v949_v14 }
 0x3bf   :  { %v954_v28 = vsel %vm953_vm10, %v2710_v7, %v950_v59 }
 0x3c0   :  { %v959_v43 = vsel %vm956_vm11, %v958_v9, %v954_v28 }
 0x3c1   :  { %v960_v15 = vmul.f32 %v3543_v23, %v959_v43 }
 0x3c2   :  { %v3610_v27 = vpop.permute.xlu0 %1282 }
 0x3c3   :  { %v1038_v26 = vmul.f32 %v960_v15, %v3086_v19 }
 0x3c5   :  { %2554 = vmatmul.msk.f32.vlgmr.msra.gmra.mxu2 %vm843_vm4, %v1038_v26 }
 0x3c6   :  { %1221 = vmatpush.msra.mxu2 %v2644_v37 }
 0x3ca   :  { %v3615_v10 = vpop.permute.xlu0 %1280 }
 0x3d2   :  { %v3617_v25 = vpop.permute.xlu0 %1336 }
 0x3da   :  { %v1311_v2 = vpop.permute.xlu0 %1310 }
 0x3db   :  { %2564 = vmatpush.xpose.msk.msra.mxu0 %vm634_vm2, %v1311_v2 }
 0x3dc   :  { %v903_v23 = vpop.xlane.xlu1 %902 }
 0x3dd   :  { %2711 = vrcp.f32 %v903_v23  ;;  %v972_v29 = vand.u32 2147483648, %v903_v23  ;;  %v970_v14 = vand.u32 2147483647, %v903_v23  ;;  %vm966_vm15 = vweird.f32 %v903_v23 }
 0x3df   :  { %v973_v15 = vor.u32 1.1754944e-38, %v972_v29  ;;  %vm971_vm14 = vcmp.eq.f32.partialorder %v970_v14, 8.507059e+37  ;;  %v2645_v14 = vunpack.i.h.bf16 %v3528_v13 }
 0x3e2   :  { %v906_v62 = vpop.xlane.xlu2 %905 }
 0x3e3   :  { %v2712_v45 = vpop.eup %2711  ;;  %2713 = vrcp.f32 %v906_v62  ;;  %v985_v6 = vand.u32 2147483647, %v906_v62  ;;  %vm981_vm3 = vweird.f32 %v906_v62 }
 0x3e4   :  { %v962_v7 = vmul.f32 %v2712_v45, %v903_v23  ;;  %v909_v35 = vpop.xlane.xlu1 %908  ;;  %vm967_vm12 = vweird.f32 %v2712_v45 }
 0x3e5   :  { %2715 = vrcp.f32 %v909_v35  ;;  %vm968_vm13 = vmor %vm966_vm15, %vm967_vm12  ;;  %v1000_v23 = vand.u32 2147483647, %v909_v35  ;;  %vm986_vm7 = vcmp.eq.f32.partialorder %v985_v6, 8.507059e+37  ;;  %vm996_vm8 = vweird.f32 %v909_v35 }
 0x3e6   :  { %v963_v16 = vsub.f32 1.0, %v962_v7  ;;  %v987_v7 = vand.u32 2147483648, %v906_v62 }
 0x3e7   :  { %vm1001_vm10 = vcmp.eq.f32.partialorder %v1000_v23, 8.507059e+37 }
 0x3e8   :  { %v964_v57 = vmul.f32 %v2712_v45, %v963_v16 }
 0x3e9   :  { %v2714_v54 = vpop.eup %2713 }
 0x3ea   :  { %v965_v59 = vadd.f32 %v2712_v45, %v964_v57  ;;  %v977_v9 = vmul.f32 %v2714_v54, %v906_v62  ;;  %v912_v28 = vpop.xlane.xlu2 %911  ;;  %vm982_vm1 = vweird.f32 %v2714_v54  ;;  %v1002_v57 = vand.u32 2147483648, %v909_v35 }
 0x3eb   :  { %v2716_v43 = vpop.eup %2715  ;;  %2717 = vrcp.f32 %v912_v28  ;;  %vm983_vm6 = vmor %vm981_vm3, %vm982_vm1  ;;  %v1015_v6 = vand.u32 2147483647, %v912_v28  ;;  %vm1011_vm12 = vweird.f32 %v912_v28 }
 0x3ec   :  { %v969_v26 = vsel %vm968_vm13, %v2712_v45, %v965_v59  ;;  %v978_v37 = vsub.f32 1.0, %v977_v9  ;;  %v992_v2 = vmul.f32 %v2716_v43, %v909_v35  ;;  %vm997_vm5 = vweird.f32 %v2716_v43 }
 0x3ed   :  { %v974_v1 = vsel %vm971_vm14, %v973_v15, %v969_v26  ;;  %v988_v59 = vor.u32 1.1754944e-38, %v987_v7  ;;  %vm998_vm9 = vmor %vm996_vm8, %vm997_vm5  ;;  %vm1016_vm13 = vcmp.eq.f32.partialorder %v1015_v6, 8.507059e+37 }
 0x3ee   :  { %v975_v16 = vmul.f32 %v3559_v44, %v974_v1  ;;  %v979_v21 = vmul.f32 %v2714_v54, %v978_v37  ;;  %v993_v48 = vsub.f32 1.0, %v992_v2  ;;  %v1017_v2 = vand.u32 2147483648, %v912_v28 }
 0x3f0   :  { %v980_v53 = vadd.f32 %v2714_v54, %v979_v21  ;;  %v994_v50 = vmul.f32 %v2716_v43, %v993_v48  ;;  %v1039_v29 = vmul.f32 %v975_v16, %v3113_v31  ;;  %v1003_v21 = vor.u32 1.1754944e-38, %v1002_v57 }
 0x3f1   :  { %v2718_v45 = vpop.eup %2717 }
 0x3f2   :  { %v984_v9 = vsel %vm983_vm6, %v2714_v54, %v980_v53  ;;  %v995_v15 = vadd.f32 %v2716_v43, %v994_v50  ;;  %v1007_v1 = vmul.f32 %v2718_v45, %v912_v28  ;;  %v915_v44 = vpop.xlane.xlu2 %914  ;;  %2555 = vmatmul.msk.f32.vlgmr.msra.gmra.mxu3 %vm843_vm4, %v1039_v29  ;;  %vm1012_vm11 = vweird.f32 %v2718_v45 }
 0x3f3   :  { %v989_v62 = vsel %vm986_vm7, %v988_v59, %v984_v9  ;;  %2719 = vrcp.f32 %v915_v44  ;;  %1247 = vmatpush.msra.mxu3 %v2645_v14  ;;  %vm1013_vm15 = vmor %vm1011_vm12, %vm1012_vm11  ;;  %v1032_v59 = vand.u32 2147483648, %v915_v44  ;;  %vm1026_vm1 = vweird.f32 %v915_v44 }
 0x3f4   :  { %v990_v48 = vmul.f32 %v3565_v4, %v989_v62  ;;  %v999_v26 = vsel %vm998_vm9, %v2716_v43, %v995_v15  ;;  %v1008_v13 = vsub.f32 1.0, %v1007_v1  ;;  %v1018_v4 = vor.u32 1.1754944e-38, %v1017_v2 }
 0x3f5   :  { %v1004_v37 = vsel %vm1001_vm10, %v1003_v21, %v999_v26  ;;  %v1421_v26 = vpop.permute.xlu0 %1420 }
 0x3f6   :  { %v1005_v53 = vmul.f32 %v3567_v51, %v1004_v37  ;;  %v1009_v50 = vmul.f32 %v2718_v45, %v1008_v13  ;;  %v1040_v35 = vmul.f32 %v990_v48, %v3096_v24 }
 0x3f8   :  { %v1010_v54 = vadd.f32 %v2718_v45, %v1009_v50  ;;  %2556 = vmatmul.msk.f32.vlgmr.msrb.gmra.mxu2 %vm843_vm4, %v1040_v35  ;;  %v1041_v7 = vmul.f32 %v1005_v53, %v3136_v42 }
 0x3f9   :  { %v2720_v16 = vpop.eup %2719  ;;  %2560 = vmatpush.xpose.msk.msrb.mxu2 %vm634_vm2, %v3597_v58  ;;  %v1030_v58 = vand.u32 2147483647, %v915_v44 }
 0x3fa   :  { %v1014_v43 = vsel %vm1013_vm15, %v2718_v45, %v1010_v54  ;;  %v1022_v23 = vmul.f32 %v2720_v16, %v915_v44  ;;  %v1395_v51 = vpop.permute.xlu2 %1394  ;;  %2557 = vmatmul.msk.f32.vlgmr.msrb.gmra.mxu3 %vm843_vm4, %v1041_v7  ;;  %vm1027_vm14 = vweird.f32 %v2720_v16 }
 0x3fb   :  { %v1019_v57 = vsel %vm1016_vm13, %v1018_v4, %v1014_v43  ;;  %2562 = vmatpush.xpose.msk.msrb.mxu3 %vm634_vm2, %v3610_v27  ;;  %vm1028_vm3 = vmor %vm1026_vm1, %vm1027_vm14  ;;  %v1033_v27 = vor.u32 1.1754944e-38, %v1032_v59  ;;  %vm1031_vm5 = vcmp.eq.f32.partialorder %v1030_v58, 8.507059e+37 }
 0x3fc   :  { %v1020_v28 = vmul.f32 %v3575_v63, %v1019_v57  ;;  %v1023_v29 = vsub.f32 1.0, %v1022_v23  ;;  %v1339_v14 = vpop.permute.xlu1 %1338 }
 0x3fd   :  { %2566 = vmatpush.xpose.msk.msra.mxu1 %vm634_vm2, %v1339_v14 }
 0x3fe   :  { %v1024_v9 = vmul.f32 %v2720_v16, %v1023_v29  ;;  %v1042_v45 = vmul.f32 %v1020_v28, %v3132_v39 }
 0x400   :  { %v1025_v15 = vadd.f32 %v2720_v16, %v1024_v9  ;;  %2558 = vmatmul.msk.f32.vlgmr.msra.gmra.mxu2 %vm843_vm4, %v1042_v45  ;;  %2567 = vmatmul.msk.f32.vlgmr.msra.gmra.mxu1 %vm634_vm2, %v3617_v25 }
 0x401   :  { %2568 = vmatpush.xpose.msk.msra.mxu2 %vm634_vm2, %v3619_v41 }
 0x402   :  { %v1029_v63 = vsel %vm1028_vm3, %v2720_v16, %v1025_v15  ;;  %v1309_v1 = vpop.permute.xlu2 %1308 }
 0x403   :  { %v1034_v62 = vsel %vm1031_vm5, %v1033_v27, %v1029_v63  ;;  %2565 = vmatmul.msk.f32.vlgmr.msra.gmra.mxu0 %vm634_vm2, %v1309_v1 }
 0x404   :  { %v1035_v21 = vmul.f32 %v3579_v60, %v1034_v62  ;;  %v1393_v48 = vpop.permute.xlu1 %1392 }
 0x406   :  { %v1043_v44 = vmul.f32 %v1035_v21, %v3149_v47 }
 0x408   :  { %2559 = vmatmul.msk.f32.vlgmr.msra.gmra.mxu3 %vm843_vm4, %v1043_v44  ;;  %2561 = vmatmul.msk.f32.vlgmr.msrb.gmra.mxu2 %vm634_vm2, %v3585_v36 }
 0x409   :  { %2570 = vmatpush.xpose.msk.msra.mxu3 %vm634_vm2, %v1395_v51 }
 0x40a   :  { %v1451_v25 = vpop.permute.xlu2 %1450 }
 0x40b   :  { %2574 = vmatpush.xpose.msk.msrb.mxu1 %vm634_vm2, %v1451_v25 }
 0x40c   :  { %v1423_v41 = vpop.permute.xlu1 %1422 }
 0x40d   :  { %2572 = vmatpush.xpose.msk.msrb.mxu0 %vm634_vm2, %v1423_v41 }
 0x410   :  { %2563 = vmatmul.msk.f32.vlgmr.msrb.gmra.mxu3 %vm634_vm2, %v3615_v10  ;;  %2569 = vmatmul.msk.f32.vlgmr.msra.gmra.mxu2 %vm634_vm2, %v3621_v30 }
 0x411   :  { %2573 = vmatmul.msk.f32.vlgmr.msrb.gmra.mxu0 %vm634_vm2, %v1421_v26 }
 0x414   :  { %v1449_v60 = vpop.permute.xlu1 %1448 }
 0x415   :  { %2575 = vmatmul.msk.f32.vlgmr.msrb.gmra.mxu1 %vm634_vm2, %v1449_v60 }
 0x418   :  { %2571 = vmatmul.msk.f32.vlgmr.msra.gmra.mxu3 %vm634_vm2, %v1393_v48 }
 0x432   :  { %v3662_v36 = vpop.f32.mrf.mxu2 }
 0x43a   :  { %v3664_v13 = vpop.f32.mrf.mxu3 }
 0x448   :  { %v3666_v37 = vpop.f32.mrf.mxu2 }
 0x475   :  { %v3668_v6 = vpop.f32.mrf.mxu3 }
 0x47b   :  { %v3670_v2 = vpop.f32.mrf.mxu2 }
 0x47d   :  { %v1361_v10 = vpop.f32.mrf.mxu1  ;;  %v3674_v50 = vpop.f32.mrf.mxu3 }
 0x47e   :  { %v1362_v30 = vadd.f32 %v1361_v10, %v3477_v49 }
 0x480   :  { %v1485_v53 = vsel %vm843_vm4, %v1362_v30, -inf  ;;  %v1333_v54 = vpop.f32.mrf.mxu0 }
 0x481   :  { %1486 = vmax.xlane.f32.xlu2 %v1485_v53  ;;  %v1334_v59 = vadd.f32 %v1333_v54, %v3463_v22  ;;  %v2651_v54 = vpack.i.bf16 %v3257_v61, %v3215_v33 }
 0x483   :  { %v3676_v35 = vpop.f32.mrf.mxu2 }
 0x48b   :  { %v3678_v7 = vpop.f32.mrf.mxu3  ;;  %v1277_v16 = vpop.f32.mrf.mxu2 }
 0x48c   :  { %v1278_v4 = vadd.f32 %v1277_v16, %v3432_v3 }
 0x48e   :  { %v1476_v43 = vsel %vm843_vm4, %v1278_v4, -inf  ;;  %v1445_v23 = vpop.f32.mrf.mxu0 }
 0x48f   :  { %1477 = vmax.xlane.f32.xlu0 %v1476_v43  ;;  %v1446_v51 = vadd.f32 %v1445_v23, %v3513_v55  ;;  %v1482_v55 = vsel %vm843_vm4, %v1334_v59, -inf }
 0x491   :  { %v1494_v29 = vsel %vm843_vm4, %v1446_v51, -inf }
 0x492   :  { %v1473_v15 = vpop.f32.mrf.mxu1 }
 0x493   :  { %v1305_v49 = vpop.f32.mrf.mxu3  ;;  %v1389_v14 = vpop.f32.mrf.mxu2  ;;  %v1474_v27 = vadd.f32 %v1473_v15, %v3520_v0 }
 0x494   :  { %v1306_v57 = vadd.f32 %v1305_v49, %v3445_v12  ;;  %v1390_v3 = vadd.f32 %v1389_v14, %v3491_v11 }
 0x495   :  { %v1497_v63 = vsel %vm843_vm4, %v1474_v27, -inf }
 0x496   :  { %v1479_v28 = vsel %vm843_vm4, %v1306_v57, -inf  ;;  %v1488_v12 = vsel %vm843_vm4, %v1390_v3, -inf }
 0x497   :  { %1480 = vmax.xlane.f32.xlu1 %v1479_v28  ;;  %1495 = vmax.xlane.f32.xlu0 %v1494_v29 }
 0x49b   :  { %v1417_v9 = vpop.f32.mrf.mxu3 }
 0x49c   :  { %v1418_v58 = vadd.f32 %v1417_v9, %v3505_v38 }
 0x49e   :  { %v1491_v45 = vsel %vm843_vm4, %v1418_v58, -inf }
 0x49f   :  { %1492 = vmax.xlane.f32.xlu2 %v1491_v45  ;;  %1483 = vmax.xlane.f32.xlu1 %v1482_v55  ;;  %v2646_v55 = vpack.i.bf16 %v3246_v56, %v3197_v18 }
 0x4a0   :  { %1489 = vmax.xlane.f32.xlu0 %v1488_v12 }
 0x4a7   :  { %1498 = vmax.xlane.f32.xlu2 %v1497_v63 }
 0x4f4   :  { %v1487_v22 = vpop.xlane.xlu2 %1486 }
 0x4f5   :  { %v1503_v11 = vsub.f32 %v1362_v30, %v1487_v22 }
 0x4f7   :  { %v1514_v1 = vmul.f32 1.442695, %v1503_v11 }
 0x4f9   :  { %2721 = vpow2.f32 %v1514_v1 }
 0x4ff   :  { %v3694_v38 = vpop.eup %2721 }
 0x500   :  { %v1533_v62 = vsel %vm843_vm4, %v3694_v38, 0.0 }
 0x501   :  { %1534 = vadd.xlane.f32.xlu0 %v1533_v62 }
 0x502   :  { %v1478_v21 = vpop.xlane.xlu0 %1477 }
 0x503   :  { %v1500_v48 = vsub.f32 %v1278_v4, %v1478_v21 }
 0x505   :  { %v1508_v44 = vmul.f32 1.442695, %v1500_v48 }
 0x507   :  { %2723 = vpow2.f32 %v1508_v44 }
 0x50a   :  { %v1481_v25 = vpop.xlane.xlu1 %1480  ;;  %v1496_v10 = vpop.xlane.xlu0 %1495 }
 0x50b   :  { %v1501_v41 = vsub.f32 %v1306_v57, %v1481_v25  ;;  %v1506_v43 = vsub.f32 %v1446_v51, %v1496_v10 }
 0x50d   :  { %v3698_v0 = vpop.eup %2723  ;;  %v1510_v26 = vmul.f32 1.442695, %v1501_v41  ;;  %v1520_v49 = vmul.f32 1.442695, %v1506_v43 }
 0x50e   :  { %v1524_v60 = vsel %vm843_vm4, %v3698_v0, 0.0 }
 0x50f   :  { %2725 = vpow2.f32 %v1510_v26  ;;  %1525 = vadd.xlane.f32.xlu1 %v1524_v60 }
 0x512   :  { %v1484_v30 = vpop.xlane.xlu1 %1483 }
 0x513   :  { %v1502_v53 = vsub.f32 %v1334_v59, %v1484_v30  ;;  %v1490_v57 = vpop.xlane.xlu0 %1489  ;;  %v1493_v59 = vpop.xlane.xlu2 %1492 }
 0x514   :  { %v1504_v29 = vsub.f32 %v1390_v3, %v1490_v57  ;;  %v1505_v45 = vsub.f32 %v1418_v58, %v1493_v59  ;;  %v2656_v58 = vpack.i.bf16 %v3228_v46, %v3262_v52 }
 0x515   :  { %v3704_v16 = vpop.eup %2725  ;;  %v1512_v4 = vmul.f32 1.442695, %v1502_v53  ;;  %2652 = vrot.lane.b32.xlu0 %v2651_v54, %s2937_s1 }
 0x516   :  { %v1527_v23 = vsel %vm843_vm4, %v3704_v16, 0.0  ;;  %v1516_v61 = vmul.f32 1.442695, %v1504_v29  ;;  %v1518_v15 = vmul.f32 1.442695, %v1505_v45 }
 0x517   :  { %1528 = vadd.xlane.f32.xlu2 %v1527_v23  ;;  %2727 = vpow2.f32 %v1512_v4 }
 0x518   :  { %2729 = vpow2.f32 %v1520_v49 }
 0x519   :  { %2731 = vpow2.f32 %v1516_v61 }
 0x51a   :  { %2733 = vpow2.f32 %v1518_v15 }
 0x51b   :  { %v1499_v22 = vpop.xlane.xlu2 %1498 }
 0x51c   :  { %v1507_v11 = vsub.f32 %v1474_v27, %v1499_v22 }
 0x51d   :  { %v3709_v28 = vpop.eup %2727 }
 0x51e   :  { %v1530_v33 = vsel %vm843_vm4, %v3709_v28, 0.0  ;;  %v3713_v14 = vpop.eup %2729  ;;  %v1522_v18 = vmul.f32 1.442695, %v1507_v11 }
 0x51f   :  { %1531 = vadd.xlane.f32.xlu1 %v1530_v33  ;;  %v1542_v51 = vsel %vm843_vm4, %v3713_v14, 0.0  ;;  %v3717_v9 = vpop.eup %2731 }
 0x520   :  { %v1536_v3 = vsel %vm843_vm4, %v3717_v9, 0.0  ;;  %v3724_v12 = vpop.eup %2733  ;;  %2735 = vpow2.f32 %v1522_v18 }
 0x521   :  { %v1539_v63 = vsel %vm843_vm4, %v3724_v12, 0.0 }
 0x526   :  { %v3733_v56 = vpop.eup %2735 }
 0x527   :  { %1543 = vadd.xlane.f32.xlu1 %v1542_v51  ;;  %v1545_v1 = vsel %vm843_vm4, %v3733_v56, 0.0 }
 0x52f   :  { %2647 = vrot.lane.b32.xlu2 %v2646_v55, %s2937_s1  ;;  %1537 = vadd.xlane.f32.xlu1 %v1536_v3 }
 0x53f   :  { %1540 = vadd.xlane.f32.xlu0 %v1539_v63 }
 0x548   :  { %2657 = vrot.lane.b32.xlu1 %v2656_v58, %s2937_s1 }
 0x553   :  { %1832 = vrot.lane.b32.xlu0 %v3271_v5, %s2937_s1 }
 0x558   :  { %1546 = vadd.xlane.f32.xlu2 %v1545_v1 }
 0x55b   :  { %1858 = vrot.lane.b32.xlu0 %v3274_v8, %s2937_s1 }
 0x574   :  { %v1535_v27 = vpop.xlane.xlu0 %1534 }
 0x575   :  { %2737 = vrcp.f32 %v1535_v27  ;;  %v1604_v5 = vand.u32 2147483648, %v1535_v27  ;;  %vm1598_vm7 = vweird.f32 %v1535_v27  ;;  %v1602_v41 = vand.u32 2147483647, %v1535_v27 }
 0x577   :  { %v1605_v53 = vor.u32 1.1754944e-38, %v1604_v5  ;;  %vm1603_vm9 = vcmp.eq.f32.partialorder %v1602_v41, 8.507059e+37 }
 0x57b   :  { %v2738_v62 = vpop.eup %2737 }
 0x57c   :  { %v1594_v46 = vmul.f32 %v2738_v62, %v1535_v27  ;;  %vm1599_vm6 = vweird.f32 %v2738_v62 }
 0x57d   :  { %vm1600_vm8 = vmor %vm1598_vm7, %vm1599_vm6 }
 0x57e   :  { %v1595_v52 = vsub.f32 1.0, %v1594_v46 }
 0x580   :  { %v1596_v21 = vmul.f32 %v2738_v62, %v1595_v52 }
 0x582   :  { %v1526_v48 = vpop.xlane.xlu1 %1525  ;;  %v1597_v44 = vadd.f32 %v2738_v62, %v1596_v21 }
 0x583   :  { %2739 = vrcp.f32 %v1526_v48  ;;  %v1559_v43 = vand.u32 2147483648, %v1526_v48  ;;  %v1557_v49 = vand.u32 2147483647, %v1526_v48  ;;  %vm1553_vm11 = vweird.f32 %v1526_v48 }
 0x584   :  { %v1601_v10 = vsel %vm1600_vm8, %v2738_v62, %v1597_v44 }
 0x585   :  { %v1606_v4 = vsel %vm1603_vm9, %v1605_v53, %v1601_v10  ;;  %v1560_v61 = vor.u32 1.1754944e-38, %v1559_v43  ;;  %vm1558_vm15 = vcmp.eq.f32.partialorder %v1557_v49, 8.507059e+37 }
 0x586   :  { %v1607_v57 = vmul.f32 %v3694_v38, %v1606_v4 }
 0x587   :  { %v2653_v25 = vpop.permute.xlu0 %2652 }
 0x588   :  { %v2654_v26 = vunpack.i.l.bf16 %v2653_v25  ;;  %v2655_v11 = vunpack.i.h.bf16 %v2653_v25  ;;  %v1671_v38 = vmul.f32 %v1607_v57, %v3113_v31 }
 0x589   :  { %v2740_v60 = vpop.eup %2739 }
 0x58a   :  { %v1549_v30 = vmul.f32 %v2740_v60, %v1526_v48  ;;  %v1529_v8 = vpop.xlane.xlu2 %1528  ;;  %1723 = vmatpush.msrb.mxu3 %v2654_v26  ;;  %vm1554_vm10 = vweird.f32 %v2740_v60 }
 0x58b   :  { %2741 = vrcp.f32 %v1529_v8  ;;  %vm1555_vm12 = vmor %vm1553_vm11, %vm1554_vm10  ;;  %v1574_v18 = vand.u32 2147483648, %v1529_v8  ;;  %v1572_v27 = vand.u32 2147483647, %v1529_v8  ;;  %vm1568_vm14 = vweird.f32 %v1529_v8 }
 0x58c   :  { %v1550_v54 = vsub.f32 1.0, %v1549_v30 }
 0x58d   :  { %vm1573_vm3 = vcmp.eq.f32.partialorder %v1572_v27, 8.507059e+37 }
 0x58e   :  { %v1551_v23 = vmul.f32 %v2740_v60, %v1550_v54 }
 0x590   :  { %v1552_v29 = vadd.f32 %v2740_v60, %v1551_v23 }
 0x591   :  { %v2742_v33 = vpop.eup %2741 }
 0x592   :  { %v1556_v51 = vsel %vm1555_vm12, %v2740_v60, %v1552_v29  ;;  %v1564_v59 = vmul.f32 %v2742_v33, %v1529_v8  ;;  %v2648_v45 = vpop.permute.xlu2 %2647  ;;  %v3740_v63 = vpop.xlane.xlu1 %1531  ;;  %vm1569_vm13 = vweird.f32 %v2742_v33 }
 0x593   :  { %v1561_v55 = vsel %vm1558_vm15, %v1560_v61, %v1556_v51  ;;  %v2650_v3 = vunpack.i.h.bf16 %v2648_v45  ;;  %v2649_v15 = vunpack.i.l.bf16 %v2648_v45  ;;  %vm1570_vm1 = vmor %vm1568_vm14, %vm1569_vm13  ;;  %2743 = vrcp.f32 %v3740_v63 }
 0x594   :  { %v1562_v22 = vmul.f32 %v3698_v0, %v1561_v55  ;;  %v1565_v58 = vsub.f32 1.0, %v1564_v59  ;;  %v1575_v0 = vor.u32 1.1754944e-38, %v1574_v18  ;;  %vm1583_vm7 = vweird.f32 %v3740_v63 }
 0x595   :  { %1697 = vmatpush.msrb.mxu2 %v2649_v15  ;;  %1775 = vmatpush.msra.mxu1 %v2650_v3  ;;  %v1589_v29 = vand.u32 2147483648, %v3740_v63  ;;  %v1587_v61 = vand.u32 2147483647, %v3740_v63 }
 0x596   :  { %v1566_v1 = vmul.f32 %v2742_v33, %v1565_v58  ;;  %2579 = vmatmul.msk.f32.vlgmr.msra.gmra.mxu1 %vm843_vm4, %v1671_v38  ;;  %v1668_v62 = vmul.f32 %v1562_v22, %v3088_v20 }
 0x597   :  { %1801 = vmatpush.msra.mxu2 %v2655_v11  ;;  %v1590_v22 = vor.u32 1.1754944e-38, %v1589_v29  ;;  %vm1588_vm12 = vcmp.eq.f32.partialorder %v1587_v61, 8.507059e+37 }
 0x598   :  { %v1567_v46 = vadd.f32 %v2742_v33, %v1566_v1  ;;  %2576 = vmatmul.msk.f32.vlgmr.msrb.gmra.mxu2 %vm843_vm4, %v1668_v62 }
 0x599   :  { %v2744_v25 = vpop.eup %2743 }
 0x59a   :  { %v1571_v52 = vsel %vm1570_vm1, %v2742_v33, %v1567_v46  ;;  %v1544_v48 = vpop.xlane.xlu1 %1543  ;;  %v1579_v41 = vmul.f32 %v2744_v25, %v3740_v63  ;;  %vm1584_vm5 = vweird.f32 %v2744_v25 }
 0x59b   :  { %v1576_v21 = vsel %vm1573_vm3, %v1575_v0, %v1571_v52  ;;  %2745 = vrcp.f32 %v1544_v48  ;;  %vm3754_vm8 = vmor %vm1583_vm7, %vm1584_vm5  ;;  %v1649_v1 = vand.u32 2147483648, %v1544_v48  ;;  %vm1643_vm13 = vweird.f32 %v1544_v48 }
 0x59c   :  { %v1577_v44 = vmul.f32 %v3704_v16, %v1576_v21  ;;  %v1580_v60 = vsub.f32 1.0, %v1579_v41  ;;  %v1647_v46 = vand.u32 2147483647, %v1544_v48 }
 0x59e   :  { %v1669_v5 = vmul.f32 %v1577_v44, %v3115_v32  ;;  %v1581_v8 = vmul.f32 %v2744_v25, %v1580_v60  ;;  %v1650_v44 = vor.u32 1.1754944e-38, %v1649_v1  ;;  %vm1648_vm1 = vcmp.eq.f32.partialorder %v1647_v46, 8.507059e+37 }
 0x5a0   :  { %2577 = vmatmul.msk.f32.vlgmr.msrb.gmra.mxu3 %vm843_vm4, %v1669_v5  ;;  %v1582_v43 = vadd.f32 %v2744_v25, %v1581_v8 }
 0x5a1   :  { %v2746_v10 = vpop.eup %2745 }
 0x5a2   :  { %v1538_v26 = vpop.xlane.xlu1 %1537  ;;  %v1639_v53 = vmul.f32 %v2746_v10, %v1544_v48  ;;  %v1586_v59 = vsel %vm3754_vm8, %v2744_v25, %v1582_v43  ;;  %vm1644_vm15 = vweird.f32 %v2746_v10 }
 0x5a3   :  { %2747 = vrcp.f32 %v1538_v26  ;;  %v1619_v16 = vand.u32 2147483648, %v1538_v26  ;;  %v1617_v57 = vand.u32 2147483647, %v1538_v26  ;;  %vm1613_vm9 = vweird.f32 %v1538_v26  ;;  %vm1645_vm14 = vmor %vm1643_vm13, %vm1644_vm15 }
 0x5a4   :  { %v1640_v23 = vsub.f32 1.0, %v1639_v53  ;;  %v1591_v38 = vsel %vm1588_vm12, %v1590_v22, %v1586_v59 }
 0x5a5   :  { %v1620_v45 = vor.u32 1.1754944e-38, %v1619_v16  ;;  %vm1618_vm11 = vcmp.eq.f32.partialorder %v1617_v57, 8.507059e+37  ;;  %v1592_v62 = vmul.f32 %v3709_v28, %v1591_v38 }
 0x5a6   :  { %v1641_v3 = vmul.f32 %v2746_v10, %v1640_v23 }
 0x5a8   :  { %v1642_v18 = vadd.f32 %v2746_v10, %v1641_v3 }
 0x5a9   :  { %v2748_v30 = vpop.eup %2747 }
 0x5aa   :  { %v1609_v54 = vmul.f32 %v2748_v30, %v1538_v26  ;;  %vm1614_vm6 = vweird.f32 %v2748_v30  ;;  %v1646_v52 = vsel %vm1645_vm14, %v2746_v10, %v1642_v18  ;;  %v1670_v26 = vmul.f32 %v1592_v62, %v3086_v19 }
 0x5ab   :  { %vm1615_vm10 = vmor %vm1613_vm9, %vm1614_vm6  ;;  %v1651_v60 = vsel %vm1648_vm1, %v1650_v44, %v1646_v52 }
 0x5ac   :  { %v1610_v4 = vsub.f32 1.0, %v1609_v54  ;;  %v1652_v10 = vmul.f32 %v3713_v14, %v1651_v60 }
 0x5ae   :  { %v1611_v49 = vmul.f32 %v2748_v30, %v1610_v4  ;;  %v1674_v16 = vmul.f32 %v1652_v10, %v3132_v39 }
 0x5b0   :  { %v1612_v51 = vadd.f32 %v2748_v30, %v1611_v49 }
 0x5b2   :  { %v1541_v55 = vpop.xlane.xlu0 %1540  ;;  %v1616_v15 = vsel %vm1615_vm10, %v2748_v30, %v1612_v51 }
 0x5b3   :  { %2749 = vrcp.f32 %v1541_v55  ;;  %v1621_v11 = vsel %vm1618_vm11, %v1620_v45, %v1616_v15  ;;  %v1634_v41 = vand.u32 2147483648, %v1541_v55  ;;  %v1632_v28 = vand.u32 2147483647, %v1541_v55 }
 0x5b4   :  { %v1622_v58 = vmul.f32 %v3717_v9, %v1621_v11  ;;  %vm1628_vm5 = vweird.f32 %v1541_v55 }
 0x5b5   :  { %v1635_v8 = vor.u32 1.1754944e-38, %v1634_v41  ;;  %vm1633_vm7 = vcmp.eq.f32.partialorder %v1632_v28, 8.507059e+37 }
 0x5b6   :  { %v1672_v63 = vmul.f32 %v1622_v58, %v3096_v24 }
 0x5b8   :  { %2580 = vmatmul.msk.f32.vlgmr.msra.gmra.mxu2 %vm843_vm4, %v1672_v63 }
 0x5b9   :  { %v2750_v27 = vpop.eup %2749 }
 0x5ba   :  { %v1624_v0 = vmul.f32 %v2750_v27, %v1541_v55  ;;  %v2658_v21 = vpop.permute.xlu1 %2657  ;;  %vm1629_vm3 = vweird.f32 %v2750_v27 }
 0x5bb   :  { %v2660_v9 = vunpack.i.h.bf16 %v2658_v21  ;;  %v2659_v25 = vunpack.i.l.bf16 %v2658_v21  ;;  %vm1630_vm6 = vmor %vm1628_vm5, %vm1629_vm3 }
 0x5bc   :  { %v1625_v5 = vsub.f32 1.0, %v1624_v0 }
 0x5bd   :  { %1749 = vmatpush.msra.mxu0 %v2660_v9  ;;  %1827 = vmatpush.msra.mxu3 %v2659_v25 }
 0x5be   :  { %v1626_v30 = vmul.f32 %v2750_v27, %v1625_v5  ;;  %2578 = vmatmul.msk.f32.vlgmr.msra.gmra.mxu0 %vm843_vm4, %v1670_v26 }
 0x5c0   :  { %v1627_v48 = vadd.f32 %v2750_v27, %v1626_v30 }
 0x5c2   :  { %v1631_v53 = vsel %vm1630_vm6, %v2750_v27, %v1627_v48  ;;  %v4078_v48 = vld [vmem:[#allocation17_spill] sm:$0xff] }
 0x5c3   :  { %v1636_v54 = vsel %vm1633_vm7, %v1635_v8, %v1631_v53 }
 0x5c4   :  { %v1637_v4 = vmul.f32 %v3724_v12, %v1636_v54 }
 0x5c5   :  { %v1833_v43 = vpop.permute.xlu0 %1832 }
 0x5c6   :  { %1853 = vmatpush.msrb.mxu0 %v1833_v43  ;;  %v1673_v23 = vmul.f32 %v1637_v4, %v3136_v42  ;;  %v4079_v4 = vld [vmem:[#allocation20_spill] sm:$0xff] }
 0x5c7   :  { %2582 = vmatmul.msk.f32.vlgmr.msrb.gmra.mxu0 %vm843_vm4, %v1674_v16 }
 0x5c8   :  { %2581 = vmatmul.msk.f32.vlgmr.msra.gmra.mxu3 %vm843_vm4, %v1673_v23  ;;  %v4080_v23 = vld [vmem:[#allocation21_spill] sm:$0xff] }
 0x5cb   :  { %v1547_v49 = vpop.xlane.xlu2 %1546 }
 0x5cc   :  { %2751 = vrcp.f32 %v1547_v49  ;;  %v1664_v61 = vand.u32 2147483648, %v1547_v49  ;;  %v1662_v12 = vand.u32 2147483647, %v1547_v49  ;;  %vm1658_vm9 = vweird.f32 %v1547_v49 }
 0x5cd   :  { %v1859_v14 = vpop.permute.xlu0 %1858 }
 0x5ce   :  { %1879 = vmatpush.msrb.mxu1 %v1859_v14  ;;  %v1665_v45 = vor.u32 1.1754944e-38, %v1664_v61  ;;  %vm1663_vm11 = vcmp.eq.f32.partialorder %v1662_v12, 8.507059e+37 }
 0x5d2   :  { %v2752_v57 = vpop.eup %2751 }
 0x5d3   :  { %v1654_v29 = vmul.f32 %v2752_v57, %v1547_v49  ;;  %vm1659_vm8 = vweird.f32 %v2752_v57 }
 0x5d4   :  { %vm1660_vm10 = vmor %vm1658_vm9, %vm1659_vm8 }
 0x5d5   :  { %v1655_v33 = vsub.f32 1.0, %v1654_v29 }
 0x5d7   :  { %v1656_v51 = vmul.f32 %v2752_v57, %v1655_v33 }
 0x5d9   :  { %v1657_v59 = vadd.f32 %v2752_v57, %v1656_v51  ;;  %v4082_v51 = vld [vmem:[#allocation16_spill] sm:$0xff] }
 0x5db   :  { %v1661_v55 = vsel %vm1660_vm10, %v2752_v57, %v1657_v59  ;;  %v4081_v57 = vld [vmem:[#allocation18_spill] sm:$0xff] }
 0x5dc   :  { %v1666_v3 = vsel %vm1663_vm11, %v1665_v45, %v1661_v55 }
 0x5dd   :  { %v1667_v15 = vmul.f32 %v3733_v56, %v1666_v3 }
 0x5df   :  { %v1675_v22 = vmul.f32 %v1667_v15, %v3149_v47 }
 0x5e1   :  { %2583 = vmatmul.msk.f32.vlgmr.msrb.gmra.mxu1 %vm843_vm4, %v1675_v22 }
 0x613   :  { %v1777_v11 = vpop.f32.mrf.mxu1 }
 0x614   :  { %1898 = vrot.lane.b32.xlu0 %v1777_v11, %s2938_s2 }
 0x61b   :  { %v1699_v58 = vpop.f32.mrf.mxu2 }
 0x623   :  { %v1725_v18 = vpop.f32.mrf.mxu3 }
 0x63b   :  { %v1803_v38 = vpop.f32.mrf.mxu2  ;;  %v1751_v63 = vpop.f32.mrf.mxu0 }
 0x63c   :  { %1900 = vrot.lane.b32.xlu1 %v1803_v38, %s2938_s2 }
 0x644   :  { %1892 = vrot.lane.b32.xlu1 %v1699_v58, %s2938_s2  ;;  %v1855_v27 = vpop.f32.mrf.mxu0 }
 0x64b   :  { %v1829_v1 = vpop.f32.mrf.mxu3 }
 0x64c   :  { %1902 = vrot.lane.b32.xlu0 %v1829_v1, %s2938_s2  ;;  %1894 = vrot.lane.b32.xlu1 %v1725_v18, %s2938_s2 }
 0x654   :  { %1904 = vrot.lane.b32.xlu0 %v1855_v27, %s2938_s2 }
 0x65c   :  { %1896 = vrot.lane.b32.xlu0 %v1751_v63, %s2938_s2 }
 0x65e   :  { %v1881_v56 = vpop.f32.mrf.mxu1 }
 0x65f   :  { %1906 = vrot.lane.b32.xlu2 %v1881_v56, %s2938_s2 }
 0x686   :  { %v1899_v62 = vpop.permute.xlu0 %1898 }
 0x687   :  { %v1919_v46 = vsel %vm634_vm2, %v3668_v6, %v1899_v62 }
 0x688   :  { %v1927_v0 = vadd.f32 %v1919_v46, %v3345_v34 }
 0x68a   :  { %v1943_v52 = vsel %vm211_vm0, %v1927_v0, 0.0 }
 0x68b   :  { %1944 = vadd.xlane.f32.xlu1 %v1943_v52 }
 0x6ae   :  { %v1901_v21 = vpop.permute.xlu1 %1900 }
 0x6af   :  { %v1920_v44 = vsel %vm634_vm2, %v3670_v2, %v1901_v21  ;;  %v4077_v2 = vld [vmem:[#allocation19_spill] sm:$0xff] }
 0x6b0   :  { %v1928_v5 = vadd.f32 %v1920_v44, %v3353_v40 }
 0x6b2   :  { %v1946_v9 = vsel %vm211_vm0, %v1928_v5, 0.0 }
 0x6b3   :  { %1947 = vadd.xlane.f32.xlu0 %v1946_v9 }
 0x6b6   :  { %v1893_v25 = vpop.permute.xlu1 %1892 }
 0x6b7   :  { %v1916_v41 = vsel %vm634_vm2, %v3662_v36, %v1893_v25 }
 0x6b8   :  { %v1924_v6 = vadd.f32 %v1916_v41, %v3313_v17 }
 0x6b9   :  { %v1907_v54 = vpop.permute.xlu2 %1906 }
 0x6ba   :  { %v1934_v34 = vsel %vm211_vm0, %v1924_v6, 0.0 }
 0x6bb   :  { %1935 = vadd.xlane.f32.xlu1 %v1934_v34 }
 0x6be   :  { %v1903_v26 = vpop.permute.xlu0 %1902  ;;  %v1895_v60 = vpop.permute.xlu1 %1894 }
 0x6bf   :  { %v1921_v30 = vsel %vm634_vm2, %v3674_v50, %v1903_v26  ;;  %v1917_v40 = vsel %vm634_vm2, %v3664_v13, %v1895_v60  ;;  %v1923_v13 = vsel %vm634_vm2, %v3678_v7, %v1907_v54  ;;  %v2133_v54 = vld [vmem:[#allocation8 + $0x8] sm:$0xff] }
 0x6c0   :  { %v1929_v28 = vadd.f32 %v1921_v30, %v4077_v2  ;;  %v1925_v10 = vadd.f32 %v1917_v40, %v4078_v48  ;;  %v1931_v49 = vadd.f32 %v1923_v13, %v4080_v23 }
 0x6c2   :  { %v1949_v8 = vsel %vm211_vm0, %v1929_v28, 0.0  ;;  %v1937_v36 = vsel %vm211_vm0, %v1925_v10, 0.0  ;;  %v1955_v33 = vsel %vm211_vm0, %v1931_v49, 0.0 }
 0x6c3   :  { %1950 = vadd.xlane.f32.xlu2 %v1949_v8  ;;  %1938 = vadd.xlane.f32.xlu1 %v1937_v36 }
 0x6c6   :  { %v1905_v17 = vpop.permute.xlu0 %1904 }
 0x6c7   :  { %v1922_v53 = vsel %vm634_vm2, %v3676_v35, %v1905_v17  ;;  %v2135_v17 = vld [vmem:[#allocation8 + $0x18] sm:$0xff] }
 0x6c8   :  { %v1930_v50 = vadd.f32 %v1922_v53, %v4079_v4  ;;  %2600 = vmatpush.msrb.mxu2 %v2135_v17  ;;  %2176 = vmatpush.msra.mxu0 %v2135_v17  ;;  %v2134_v53 = vld [vmem:[#allocation8 + $0x10] sm:$0xff]  ;;  %v2132_v4 = vld [vmem:[#allocation8] sm:$0xff] }
 0x6ca   :  { %v1952_v43 = vsel %vm211_vm0, %v1930_v50, 0.0  ;;  %2601 = vmatpush.msrb.mxu2 %v2134_v53  ;;  %2177 = vmatpush.msra.mxu0 %v2134_v53 }
 0x6cb   :  { %1953 = vadd.xlane.f32.xlu0 %v1952_v43 }
 0x6cc   :  { %2602 = vmatpush.msrb.mxu2 %v2133_v54  ;;  %2178 = vmatpush.msra.mxu0 %v2133_v54 }
 0x6ce   :  { %v1897_v16 = vpop.permute.xlu0 %1896  ;;  %2603 = vmatpush.msrb.mxu2 %v2132_v4  ;;  %2179 = vmatpush.msra.mxu0 %v2132_v4 }
 0x6cf   :  { %v1918_v14 = vsel %vm634_vm2, %v3666_v37, %v1897_v16 }
 0x6d0   :  { %v1926_v29 = vadd.f32 %v1918_v14, %v4081_v57 }
 0x6d2   :  { %v1940_v35 = vsel %vm211_vm0, %v1926_v29, 0.0 }
 0x6d3   :  { %1956 = vadd.xlane.f32.xlu0 %v1955_v33  ;;  %1941 = vadd.xlane.f32.xlu1 %v1940_v35  ;;  %v3860_v33 = vld [vmem:[%s4042_s10] ss:$0 sm:$0xff] }
 0x6fe   :  { %v1945_v61 = vpop.xlane.xlu1 %1944 }
 0x6ff   :  { %v1961_v12 = vmul.f32 %v1945_v61, %v4082_v51 }
 0x701   :  { %v3809_v59 = vsub.f32 %v1927_v0, %v1961_v12  ;;  %v3866_v12 = vld [vmem:[%s4043_s11] ss:$0 sm:$0xff] }
 0x703   :  { %v1977_v7 = vmul.f32 %v3809_v59, %v3809_v59 }
 0x705   :  { %v1991_v45 = vsel %vm211_vm0, %v1977_v7, 0.0 }
 0x706   :  { %1992 = vadd.xlane.f32.xlu2 %v1991_v45 }
 0x726   :  { %v1948_v37 = vpop.xlane.xlu0 %1947 }
 0x727   :  { %v1962_v55 = vmul.f32 %v1948_v37, %v4082_v51 }
 0x729   :  { %v3815_v3 = vsub.f32 %v1928_v5, %v1962_v55 }
 0x72b   :  { %v1978_v15 = vmul.f32 %v3815_v3, %v3815_v3 }
 0x72d   :  { %v1994_v22 = vsel %vm211_vm0, %v1978_v15, 0.0 }
 0x72e   :  { %v1936_v11 = vpop.xlane.xlu1 %1935  ;;  %1995 = vadd.xlane.f32.xlu0 %v1994_v22 }
 0x72f   :  { %v1958_v58 = vmul.f32 %v1936_v11, %v4082_v51 }
 0x731   :  { %v3821_v38 = vsub.f32 %v1924_v6, %v1958_v58 }
 0x733   :  { %v1974_v18 = vmul.f32 %v3821_v38, %v3821_v38 }
 0x735   :  { %v1982_v63 = vsel %vm211_vm0, %v1974_v18, 0.0 }
 0x736   :  { %v1951_v1 = vpop.xlane.xlu2 %1950  ;;  %v1939_v27 = vpop.xlane.xlu1 %1938  ;;  %1983 = vadd.xlane.f32.xlu2 %v1982_v63 }
 0x737   :  { %v1963_v56 = vmul.f32 %v1951_v1, %v4082_v51  ;;  %v1959_v62 = vmul.f32 %v1939_v27, %v4082_v51 }
 0x739   :  { %v3828_v46 = vsub.f32 %v1929_v28, %v1963_v56  ;;  %v3832_v52 = vsub.f32 %v1925_v10, %v1959_v62 }
 0x73b   :  { %v1979_v0 = vmul.f32 %v3828_v46, %v3828_v46  ;;  %v1975_v25 = vmul.f32 %v3832_v52, %v3832_v52 }
 0x73d   :  { %v1997_v21 = vsel %vm211_vm0, %v1979_v0, 0.0  ;;  %v1985_v6 = vsel %vm211_vm0, %v1975_v25, 0.0 }
 0x73e   :  { %1998 = vadd.xlane.f32.xlu1 %v1997_v21  ;;  %v1954_v44 = vpop.xlane.xlu0 %1953 }
 0x73f   :  { %v1964_v5 = vmul.f32 %v1954_v44, %v4082_v51 }
 0x741   :  { %v3836_v9 = vsub.f32 %v1930_v50, %v1964_v5 }
 0x743   :  { %v1980_v41 = vmul.f32 %v3836_v9, %v3836_v9 }
 0x745   :  { %v2000_v34 = vsel %vm211_vm0, %v1980_v41, 0.0 }
 0x746   :  { %1986 = vadd.xlane.f32.xlu1 %v1985_v6  ;;  %v1942_v26 = vpop.xlane.xlu1 %1941  ;;  %2001 = vadd.xlane.f32.xlu0 %v2000_v34  ;;  %v1957_v60 = vpop.xlane.xlu0 %1956 }
 0x747   :  { %v1960_v30 = vmul.f32 %v1942_v26, %v4082_v51  ;;  %v1965_v40 = vmul.f32 %v1957_v60, %v4082_v51 }
 0x749   :  { %v3846_v2 = vsub.f32 %v1926_v29, %v1960_v30  ;;  %v3848_v28 = vsub.f32 %v1931_v49, %v1965_v40 }
 0x74b   :  { %v1976_v48 = vmul.f32 %v3846_v2, %v3846_v2  ;;  %v1981_v10 = vmul.f32 %v3848_v28, %v3848_v28 }
 0x74d   :  { %v1988_v8 = vsel %vm211_vm0, %v1976_v48, 0.0  ;;  %v2003_v36 = vsel %vm211_vm0, %v1981_v10, 0.0 }
 0x74e   :  { %1989 = vadd.xlane.f32.xlu0 %v1988_v8  ;;  %2004 = vadd.xlane.f32.xlu2 %v2003_v36 }
 0x779   :  { %v1993_v50 = vpop.xlane.xlu2 %1992 }
 0x77a   :  { %v2009_v43 = vmul.f32 %v1993_v50, %v4082_v51  ;;  %v2216_v50 = vld [vmem:[#allocation10 + $0x18] sm:$0xff] }
 0x77b   :  { %2604 = vmatpush.msrb.mxu3 %v2216_v50  ;;  %2257 = vmatpush.msra.mxu1 %v2216_v50 }
 0x77c   :  { %v2017_v13 = vadd.f32 1e-05, %v2009_v43 }
 0x77e   :  { %2753 = vrsqrt.f32 %v2017_v13  ;;  %vm2058_vm4 = vweird.f32 %v2017_v13 }
 0x784   :  { %v2754_v16 = vpop.eup %2753 }
 0x785   :  { %v2053_v23 = vmul.f32 %v2754_v16, %v2017_v13  ;;  %vm2059_vm2 = vweird.f32 %v2754_v16 }
 0x786   :  { %vm2060_vm12 = vmor %vm2058_vm4, %vm2059_vm2 }
 0x787   :  { %v2054_v49 = vmul.f32 %v2754_v16, %v2053_v23 }
 0x789   :  { %v2055_v14 = vmul.f32 0.5, %v2054_v49 }
 0x78b   :  { %v2056_v57 = vsub.f32 1.5, %v2055_v14 }
 0x78d   :  { %v2057_v29 = vmul.f32 %v2754_v16, %v2056_v57 }
 0x78f   :  { %v2061_v35 = vsel %vm2060_vm12, %v2754_v16, %v2057_v29 }
 0x790   :  { %v2105_v61 = vmul.f32 %v2061_v35, %v3809_v59 }
 0x792   :  { %v2116_v7 = vmul.f32 %v3860_v33, %v2105_v61 }
 0x794   :  { %v3870_v45 = vadd.f32 %v3866_v12, %v2116_v7 }
 0x796   :  { %2587 = vmatmul.msk.f32.vlgmr.msrb.gmra.mxu2 %vm211_vm0, %v3870_v45 }
 0x7a1   :  { %v1996_v37 = vpop.xlane.xlu0 %1995 }
 0x7a2   :  { %v2010_v55 = vmul.f32 %v1996_v37, %v4082_v51 }
 0x7a4   :  { %v2018_v15 = vadd.f32 1e-05, %v2010_v55 }
 0x7a6   :  { %2755 = vrsqrt.f32 %v2018_v15  ;;  %vm2068_vm13 = vweird.f32 %v2018_v15 }
 0x7a9   :  { %v1984_v22 = vpop.xlane.xlu2 %1983 }
 0x7aa   :  { %v2006_v59 = vmul.f32 %v1984_v22, %v4082_v51 }
 0x7ac   :  { %v2756_v11 = vpop.eup %2755  ;;  %v2014_v58 = vadd.f32 1e-05, %v2006_v59 }
 0x7ad   :  { %v2063_v18 = vmul.f32 %v2756_v11, %v2018_v15  ;;  %vm2069_vm15 = vweird.f32 %v2756_v11 }
 0x7ae   :  { %2757 = vrsqrt.f32 %v2014_v58  ;;  %vm2070_vm14 = vmor %vm2068_vm13, %vm2069_vm15  ;;  %vm2028_vm3 = vweird.f32 %v2014_v58 }
 0x7af   :  { %v2064_v63 = vmul.f32 %v2756_v11, %v2063_v18 }
 0x7b1   :  { %v1999_v1 = vpop.xlane.xlu1 %1998  ;;  %v2065_v27 = vmul.f32 0.5, %v2064_v63 }
 0x7b2   :  { %v2011_v56 = vmul.f32 %v1999_v1, %v4082_v51 }
 0x7b3   :  { %v2066_v62 = vsub.f32 1.5, %v2065_v27 }
 0x7b4   :  { %v2019_v0 = vadd.f32 1e-05, %v2011_v56  ;;  %v2758_v21 = vpop.eup %2757 }
 0x7b5   :  { %v2067_v44 = vmul.f32 %v2756_v11, %v2066_v62  ;;  %v2023_v5 = vmul.f32 %v2758_v21, %v2014_v58  ;;  %vm2029_vm1 = vweird.f32 %v2758_v21 }
 0x7b6   :  { %2759 = vrsqrt.f32 %v2019_v0  ;;  %vm2030_vm5 = vmor %vm2028_vm3, %vm2029_vm1  ;;  %vm2078_vm7 = vweird.f32 %v2019_v0 }
 0x7b7   :  { %v2071_v25 = vsel %vm2070_vm14, %v2756_v11, %v2067_v44  ;;  %v2024_v41 = vmul.f32 %v2758_v21, %v2023_v5 }
 0x7b8   :  { %v2106_v26 = vmul.f32 %v2071_v25, %v3815_v3 }
 0x7b9   :  { %v1987_v6 = vpop.xlane.xlu1 %1986  ;;  %v2002_v34 = vpop.xlane.xlu0 %2001  ;;  %v2025_v60 = vmul.f32 0.5, %v2024_v41 }
 0x7ba   :  { %v2007_v30 = vmul.f32 %v1987_v6, %v4082_v51  ;;  %v2012_v40 = vmul.f32 %v2002_v34, %v4082_v51  ;;  %v2117_v48 = vmul.f32 %v3860_v33, %v2106_v26 }
 0x7bb   :  { %v2026_v8 = vsub.f32 1.5, %v2025_v60 }
 0x7bc   :  { %v2760_v10 = vpop.eup %2759  ;;  %v2015_v36 = vadd.f32 1e-05, %v2007_v30  ;;  %v2020_v17 = vadd.f32 1e-05, %v2012_v40  ;;  %v3882_v54 = vadd.f32 %v3866_v12, %v2117_v48 }
 0x7bd   :  { %v2073_v53 = vmul.f32 %v2760_v10, %v2019_v0  ;;  %v2027_v4 = vmul.f32 %v2758_v21, %v2026_v8  ;;  %vm2079_vm6 = vweird.f32 %v2760_v10 }
 0x7be   :  { %2761 = vrsqrt.f32 %v2015_v36  ;;  %2588 = vmatmul.msk.f32.gmra.mxu2 %vm211_vm0, %v3882_v54  ;;  %vm2080_vm8 = vmor %vm2078_vm7, %vm2079_vm6  ;;  %vm2038_vm11 = vweird.f32 %v2015_v36  ;;  %vm2088_vm4 = vweird.f32 %v2020_v17  ;;  %vm2333_vm6 = vcmask 261127  }
 0x7bf   :  { %v2074_v3 = vmul.f32 %v2760_v10, %v2073_v53  ;;  %2763 = vrsqrt.f32 %v2020_v17  ;;  %v2031_v43 = vsel %vm2030_vm5, %v2758_v21, %v2027_v4  ;;  %vm2317_vm7 = vcmask 1042434  }
 0x7c0   :  { %v2102_v13 = vmul.f32 %v2031_v43, %v3821_v38 }
 0x7c1   :  { %v2075_v16 = vmul.f32 0.5, %v2074_v3  ;;  %v2005_v23 = vpop.xlane.xlu2 %2004  ;;  %v1990_v49 = vpop.xlane.xlu0 %1989 }
 0x7c2   :  { %v2013_v14 = vmul.f32 %v2005_v23, %v4082_v51  ;;  %v2008_v57 = vmul.f32 %v1990_v49, %v4082_v51  ;;  %v2113_v29 = vmul.f32 %v3860_v33, %v2102_v13 }
 0x7c3   :  { %v2076_v35 = vsub.f32 1.5, %v2075_v16 }
 0x7c4   :  { %v2762_v61 = vpop.eup %2761  ;;  %v2021_v7 = vadd.f32 1e-05, %v2013_v14  ;;  %v2016_v37 = vadd.f32 1e-05, %v2008_v57  ;;  %v3891_v38 = vadd.f32 %v3866_v12, %v2113_v29 }
 0x7c5   :  { %v2764_v55 = vpop.eup %2763  ;;  %v2077_v15 = vmul.f32 %v2760_v10, %v2076_v35  ;;  %v2033_v22 = vmul.f32 %v2762_v61, %v2015_v36  ;;  %vm2039_vm9 = vweird.f32 %v2762_v61  ;;  %v2215_v35 = vld [vmem:[#allocation10 + $0x10] sm:$0xff] }
 0x7c6   :  { %v2083_v59 = vmul.f32 %v2764_v55, %v2020_v17  ;;  %2765 = vrsqrt.f32 %v2021_v7  ;;  %2584 = vmatmul.msk.f32.vlgmr.msra.gmra.mxu0 %vm211_vm0, %v3891_v38  ;;  %vm2089_vm10 = vweird.f32 %v2764_v55  ;;  %vm2040_vm2 = vmor %vm2038_vm11, %vm2039_vm9  ;;  %vm2098_vm14 = vweird.f32 %v2021_v7  ;;  %2605 = vmatpush.msrb.mxu3 %v2215_v35 }
 0x7c7   :  { %v2081_v11 = vsel %vm2080_vm8, %v2760_v10, %v2077_v15  ;;  %v2034_v58 = vmul.f32 %v2762_v61, %v2033_v22  ;;  %2767 = vrsqrt.f32 %v2016_v37  ;;  %vm2090_vm12 = vmor %vm2088_vm4, %vm2089_vm10  ;;  %vm2048_vm3 = vweird.f32 %v2016_v37  ;;  %2258 = vmatpush.msra.mxu1 %v2215_v35 }
 0x7c8   :  { %v2084_v18 = vmul.f32 %v2764_v55, %v2083_v59  ;;  %v2107_v63 = vmul.f32 %v2081_v11, %v3828_v46  ;;  %vm2320_vm8 = vcmask 1043459   ;;  %vm2323_vm9 = vcmask 1044484  }
 0x7c9   :  { %v2035_v1 = vmul.f32 0.5, %v2034_v58  ;;  %vm2326_vm10 = vcmask 1045509   ;;  %vm2329_vm11 = vcmask 1046534  }
 0x7ca   :  { %v2085_v27 = vmul.f32 0.5, %v2084_v18  ;;  %v2118_v56 = vmul.f32 %v3860_v33, %v2107_v63 }
 0x7cb   :  { %v2036_v62 = vsub.f32 1.5, %v2035_v1 }
 0x7cc   :  { %v2766_v0 = vpop.eup %2765  ;;  %v2086_v21 = vsub.f32 1.5, %v2085_v27  ;;  %v3898_v44 = vadd.f32 %v3866_v12, %v2118_v56 }
 0x7cd   :  { %v2768_v5 = vpop.eup %2767  ;;  %v2037_v25 = vmul.f32 %v2762_v61, %v2036_v62  ;;  %v2093_v41 = vmul.f32 %v2766_v0, %v2021_v7  ;;  %vm2099_vm15 = vweird.f32 %v2766_v0 }
 0x7ce   :  { %v2087_v6 = vmul.f32 %v2764_v55, %v2086_v21  ;;  %v2043_v46 = vmul.f32 %v2768_v5, %v2016_v37  ;;  %2589 = vmatmul.msk.f32.gmra.mxu2 %vm211_vm0, %v3898_v44  ;;  %vm2049_vm13 = vweird.f32 %v2768_v5  ;;  %vm2100_vm1 = vmor %vm2098_vm14, %vm2099_vm15 }
 0x7cf   :  { %v2041_v34 = vsel %vm2040_vm2, %v2762_v61, %v2037_v25  ;;  %v2094_v26 = vmul.f32 %v2766_v0, %v2093_v41  ;;  %vm2050_vm5 = vmor %vm2048_vm3, %vm2049_vm13  ;;  %vm2337_vm2 = vcmask 260096  }
 0x7d0   :  { %v2091_v60 = vsel %vm2090_vm12, %v2764_v55, %v2087_v6  ;;  %v2044_v30 = vmul.f32 %v2768_v5, %v2043_v46  ;;  %v2103_v40 = vmul.f32 %v2041_v34, %v3832_v52 }
 0x7d1   :  { %v2095_v48 = vmul.f32 0.5, %v2094_v26  ;;  %v2108_v10 = vmul.f32 %v2091_v60, %v3836_v9  ;;  %v2668_v26 = vld [vmem:[%s4047_s15] ss:$0 sm:$0xff] }
 0x7d2   :  { %v2045_v8 = vmul.f32 0.5, %v2044_v30  ;;  %v2114_v36 = vmul.f32 %v3860_v33, %v2103_v40 }
 0x7d3   :  { %v2096_v53 = vsub.f32 1.5, %v2095_v48  ;;  %v2119_v17 = vmul.f32 %v3860_v33, %v2108_v10 }
 0x7d4   :  { %v2046_v4 = vsub.f32 1.5, %v2045_v8  ;;  %v3907_v3 = vadd.f32 %v3866_v12, %v2114_v36 }
 0x7d5   :  { %v2097_v50 = vmul.f32 %v2766_v0, %v2096_v53  ;;  %v3910_v43 = vadd.f32 %v3866_v12, %v2119_v17 }
 0x7d6   :  { %v2047_v52 = vmul.f32 %v2768_v5, %v2046_v4  ;;  %2585 = vmatmul.msk.f32.gmra.mxu0 %vm211_vm0, %v3907_v3 }
 0x7d7   :  { %v2101_v9 = vsel %vm2100_vm1, %v2766_v0, %v2097_v50  ;;  %2590 = vmatmul.msk.f32.gmra.mxu2 %vm211_vm0, %v3910_v43 }
 0x7d8   :  { %v2051_v13 = vsel %vm2050_vm5, %v2768_v5, %v2047_v52  ;;  %v2109_v16 = vmul.f32 %v2101_v9, %v3848_v28  ;;  %v2213_v28 = vld [vmem:[#allocation10] sm:$0xff] }
 0x7d9   :  { %v2104_v23 = vmul.f32 %v2051_v13, %v3846_v2  ;;  %v2214_v2 = vld [vmem:[#allocation10 + $0x8] sm:$0xff] }
 0x7da   :  { %v2120_v49 = vmul.f32 %v3860_v33, %v2109_v16  ;;  %2606 = vmatpush.msrb.mxu3 %v2214_v2  ;;  %2259 = vmatpush.msra.mxu1 %v2214_v2 }
 0x7db   :  { %v2115_v14 = vmul.f32 %v3860_v33, %v2104_v23  ;;  %v2667_v33 = vld [vmem:[%s4045_s13] ss:$0 sm:$0xff] }
 0x7dc   :  { %v3921_v57 = vadd.f32 %v3866_v12, %v2120_v49  ;;  %2607 = vmatpush.msrb.mxu3 %v2213_v28  ;;  %2260 = vmatpush.msra.mxu1 %v2213_v28 }
 0x7dd   :  { %v3924_v29 = vadd.f32 %v3866_v12, %v2115_v14 }
 0x7df   :  { %2586 = vmatmul.msk.f32.gmra.mxu0 %vm211_vm0, %v3924_v29  ;;  %2591 = vmatmul.msk.f32.gmra.mxu2 %vm211_vm0, %v3921_v57 }
 0x819   :  { %v2190_v12 = vpop.f32.mrf.mxu2 }
 0x81a   :  { %v2191_v61 = vadd.f32 %v2667_v33, %v2190_v12 }
 0x81c   :  { %v2208_v7 = vmax.f32 %v2191_v61, 0.0 }
 0x81e   :  { %2595 = vmatmul.msk.f32.vlgmr.msrb.gmra.mxu3 %vm211_vm0, %v2208_v7 }
 0x841   :  { %v2193_v37 = vpop.f32.mrf.mxu2 }
 0x842   :  { %v2194_v55 = vadd.f32 %v2667_v33, %v2193_v37 }
 0x843   :  { %v2181_v15 = vpop.f32.mrf.mxu0 }
 0x844   :  { %v2209_v22 = vmax.f32 %v2194_v55, 0.0  ;;  %v2182_v59 = vadd.f32 %v2667_v33, %v2181_v15 }
 0x846   :  { %v2205_v11 = vmax.f32 %v2182_v59, 0.0  ;;  %2596 = vmatmul.msk.f32.gmra.mxu3 %vm211_vm0, %v2209_v22 }
 0x848   :  { %2592 = vmatmul.msk.f32.vlgmr.msra.gmra.mxu1 %vm211_vm0, %v2205_v11 }
 0x851   :  { %v2196_v58 = vpop.f32.mrf.mxu2 }
 0x852   :  { %v2197_v18 = vadd.f32 %v2667_v33, %v2196_v58 }
 0x853   :  { %v2184_v63 = vpop.f32.mrf.mxu0 }
 0x854   :  { %v2210_v1 = vmax.f32 %v2197_v18, 0.0  ;;  %v2185_v27 = vadd.f32 %v2667_v33, %v2184_v63 }
 0x856   :  { %v2206_v56 = vmax.f32 %v2185_v27, 0.0  ;;  %2597 = vmatmul.msk.f32.gmra.mxu3 %vm211_vm0, %v2210_v1 }
 0x858   :  { %2593 = vmatmul.msk.f32.gmra.mxu1 %vm211_vm0, %v2206_v56 }
 0x85a   :  { %v2199_v62 = vpop.f32.mrf.mxu2 }
 0x85b   :  { %v2200_v0 = vadd.f32 %v2667_v33, %v2199_v62 }
 0x85c   :  { %v2187_v21 = vpop.f32.mrf.mxu0 }
 0x85d   :  { %v2211_v5 = vmax.f32 %v2200_v0, 0.0  ;;  %v2188_v25 = vadd.f32 %v2667_v33, %v2187_v21 }
 0x85f   :  { %v2207_v41 = vmax.f32 %v2188_v25, 0.0  ;;  %2598 = vmatmul.msk.f32.gmra.mxu3 %vm211_vm0, %v2211_v5 }
 0x861   :  { %2594 = vmatmul.msk.f32.gmra.mxu1 %vm211_vm0, %v2207_v41 }
 0x862   :  { %v2202_v6 = vpop.f32.mrf.mxu2 }
 0x863   :  { %v2203_v46 = vadd.f32 %v2667_v33, %v2202_v6 }
 0x865   :  { %v2212_v34 = vmax.f32 %v2203_v46, 0.0 }
 0x867   :  { %2599 = vmatmul.msk.f32.gmra.mxu3 %vm211_vm0, %v2212_v34  ;;  %vm2314_vm0 = vcmask 1041409  }
 0x8a1   :  { %v2271_v40 = vpop.f32.mrf.mxu3 }
 0x8a2   :  { %v2272_v50 = vadd.f32 %v2668_v26, %v2271_v40 }
 0x8a4   :  { %v2289_v16 = vadd.f32 %v2272_v50, %v3870_v45 }
 0x8a6   :  { %v2297_v2 = vmul.f32 %v2289_v16, %v3113_v31 }
 0x8a8   :  { %v2316_v7 = vrot.slane %v2297_v2, 5 }
 0x8c5   :  { %v2262_v60 = vpop.f32.mrf.mxu1 }
 0x8c6   :  { %v2263_v30 = vadd.f32 %v2668_v26, %v2262_v60 }
 0x8c8   :  { %v2286_v48 = vadd.f32 %v2263_v30, %v3891_v38 }
 0x8c9   :  { %v2274_v36 = vpop.f32.mrf.mxu3 }
 0x8ca   :  { %v2294_v10 = vmul.f32 %v2286_v48, %v3088_v20  ;;  %v2275_v9 = vadd.f32 %v2668_v26, %v2274_v36 }
 0x8cc   :  { %v2334_v8 = vsel %vm2333_vm6, %v2294_v10, 0.0  ;;  %v2290_v14 = vadd.f32 %v2275_v9, %v3882_v54 }
 0x8cd   :  { %2335 = vadd.xlane.f32.xlu2 %v2334_v8 }
 0x8ce   :  { %v2298_v45 = vmul.f32 %v2290_v14, %v3096_v24 }
 0x8d5   :  { %v2265_v53 = vpop.f32.mrf.mxu1 }
 0x8d6   :  { %v2266_v17 = vadd.f32 %v2668_v26, %v2265_v53 }
 0x8d8   :  { %v2287_v52 = vadd.f32 %v2266_v17, %v3907_v3 }
 0x8d9   :  { %v2277_v4 = vpop.f32.mrf.mxu3 }
 0x8da   :  { %v2295_v38 = vmul.f32 %v2287_v52, %v3115_v32  ;;  %v2278_v49 = vadd.f32 %v2668_v26, %v2277_v4 }
 0x8dc   :  { %v2312_v3 = vrot.slane %v2295_v38, 7  ;;  %v2291_v12 = vadd.f32 %v2278_v49, %v3898_v44 }
 0x8de   :  { %v2268_v13 = vpop.f32.mrf.mxu1  ;;  %v2299_v54 = vmul.f32 %v2291_v12, %v3136_v42 }
 0x8df   :  { %v2269_v23 = vadd.f32 %v2668_v26, %v2268_v13 }
 0x8e0   :  { %v2322_v24 = vrot.slane %v2299_v54, 3 }
 0x8e1   :  { %v2288_v20 = vadd.f32 %v2269_v23, %v3924_v29 }
 0x8e2   :  { %v2280_v35 = vpop.f32.mrf.mxu3 }
 0x8e3   :  { %v2296_v28 = vmul.f32 %v2288_v20, %v3086_v19  ;;  %v2281_v33 = vadd.f32 %v2668_v26, %v2280_v35  ;;  %v2319_v19 = vrot.slane %v2298_v45, 4 }
 0x8e5   :  { %v2313_v61 = vrot.slane %v2296_v28, 6  ;;  %v2292_v32 = vadd.f32 %v2281_v33, %v3910_v43 }
 0x8e7   :  { %v2315_v29 = vsel %vm2314_vm0, %v2313_v61, %v2312_v3  ;;  %v2300_v37 = vmul.f32 %v2292_v32, %v3132_v39 }
 0x8e8   :  { %v2318_v31 = vsel %vm2317_vm7, %v2316_v7, %v2315_v29 }
 0x8e9   :  { %v2321_v44 = vsel %vm2320_vm8, %v2319_v19, %v2318_v31  ;;  %v2325_v22 = vrot.slane %v2300_v37, 2 }
 0x8ea   :  { %v2283_v55 = vpop.f32.mrf.mxu3  ;;  %v2324_v11 = vsel %vm2323_vm9, %v2322_v24, %v2321_v44  ;;  %v2670_v24 = vld [vmem:[%s4049_s17] ss:$0 sm:$0xff] }
 0x8eb   :  { %v2284_v15 = vadd.f32 %v2668_v26, %v2283_v55  ;;  %v2327_v58 = vsel %vm2326_vm10, %v2325_v22, %v2324_v11  ;;  %v2669_v55 = vld [vmem:[%s4048_s16] ss:$0 sm:$0xff]  ;;  %s2939_s16 = smov [#allocation11]  }
 0x8ec   :  { %s2506_s17 = sshll.u32 %s2939_s16, 4  ;;  %s2507_s17 = int_to_ptr.vmem [resolvable:$true] %s2506_s17 }
 0x8ed   :  { %v2293_v43 = vadd.f32 %v2284_v15, %v3921_v57 }
 0x8ef   :  { %v2301_v59 = vmul.f32 %v2293_v43, %v3149_v47 }
 0x8f1   :  { %v2328_v42 = vrot.slane %v2301_v59, 1 }
 0x8f3   :  { %v2330_v39 = vsel %vm2329_vm11, %v2328_v42, %v2327_v58 }
 0x8f4   :  { %v2338_v18 = vsel %vm2337_vm2, %v2330_v39, 0.0 }
 0x8f5   :  { %2339 = vadd.xlane.f32.xlu1 %v2338_v18 }
 0x940   :  { %v2336_v63 = vpop.xlane.xlu2 %2335 }
 0x941   :  { %v2341_v1 = vmul.f32 %v2336_v63, %v4082_v51 }
 0x943   :  { %v2360_v57 = vsub.f32 %v2294_v10, %v2341_v1 }
 0x945   :  { %v2368_v27 = vmul.f32 %v2360_v57, %v2360_v57 }
 0x947   :  { %v2399_v47 = vsel %vm2333_vm6, %v2368_v27, 0.0 }
 0x948   :  { %2400 = vadd.xlane.f32.xlu1 %v2399_v47 }
 0x968   :  { %v2340_v56 = vpop.xlane.xlu1 %2339 }
 0x969   :  { %v2342_v62 = vmul.f32 %v2340_v56, %v4082_v51 }
 0x96b   :  { %v2345_v0 = vrot.slane %v2342_v62, 1  ;;  %v2346_v21 = vrot.slane %v2342_v62, 2  ;;  %v2347_v5 = vrot.slane %v2342_v62, 3  ;;  %v2348_v25 = vrot.slane %v2342_v62, 4 }
 0x96c   :  { %v2349_v41 = vrot.slane %v2342_v62, 5  ;;  %v2350_v6 = vrot.slane %v2342_v62, 6  ;;  %v2351_v46 = vrot.slane %v2342_v62, 7 }
 0x96d   :  { %v3971_v34 = vsub.f32 %v2295_v38, %v2345_v0  ;;  %v3973_v26 = vsub.f32 %v2296_v28, %v2346_v21  ;;  %v3975_v60 = vsub.f32 %v2297_v2, %v2347_v5  ;;  %v3977_v30 = vsub.f32 %v2298_v45, %v2348_v25 }
 0x96e   :  { %v3979_v40 = vsub.f32 %v2299_v54, %v2349_v41  ;;  %v3981_v48 = vsub.f32 %v2300_v37, %v2350_v6  ;;  %v3983_v10 = vsub.f32 %v2301_v59, %v2351_v46 }
 0x96f   :  { %v2369_v8 = vmul.f32 %v3971_v34, %v3971_v34  ;;  %v2370_v36 = vmul.f32 %v3973_v26, %v3973_v26  ;;  %v2371_v53 = vmul.f32 %v3975_v60, %v3975_v60  ;;  %v2372_v17 = vmul.f32 %v3977_v30, %v3977_v30 }
 0x970   :  { %v2373_v4 = vmul.f32 %v3979_v40, %v3979_v40  ;;  %v2374_v50 = vmul.f32 %v3981_v48, %v3981_v48  ;;  %v2375_v16 = vmul.f32 %v3983_v10, %v3983_v10 }
 0x971   :  { %v2384_v52 = vrot.slane %v2369_v8, 7  ;;  %v2385_v9 = vrot.slane %v2370_v36, 6  ;;  %v2387_v13 = vrot.slane %v2371_v53, 5  ;;  %v2389_v38 = vrot.slane %v2372_v17, 4 }
 0x972   :  { %v2391_v20 = vrot.slane %v2373_v4, 3  ;;  %v2393_v35 = vrot.slane %v2374_v50, 2  ;;  %v2395_v28 = vrot.slane %v2375_v16, 1 }
 0x973   :  { %v2386_v23 = vsel %vm2314_vm0, %v2385_v9, %v2384_v52 }
 0x974   :  { %v2388_v49 = vsel %vm2317_vm7, %v2387_v13, %v2386_v23 }
 0x975   :  { %v2390_v14 = vsel %vm2320_vm8, %v2389_v38, %v2388_v49 }
 0x976   :  { %v2392_v2 = vsel %vm2323_vm9, %v2391_v20, %v2390_v14 }
 0x977   :  { %v2394_v33 = vsel %vm2326_vm10, %v2393_v35, %v2392_v2 }
 0x978   :  { %v2396_v3 = vsel %vm2329_vm11, %v2395_v28, %v2394_v33 }
 0x979   :  { %v2402_v12 = vsel %vm2337_vm2, %v2396_v3, 0.0 }
 0x97a   :  { %2403 = vadd.xlane.f32.xlu0 %v2402_v12 }
 0x9bb   :  { %v2401_v61 = vpop.xlane.xlu1 %2400 }
 0x9bc   :  { %v2405_v45 = vmul.f32 %v2401_v61, %v4082_v51 }
 0x9be   :  { %v2407_v32 = vadd.f32 1e-05, %v2405_v45 }
 0x9c0   :  { %2769 = vrsqrt.f32 %v2407_v32  ;;  %vm2415_vm12 = vweird.f32 %v2407_v32 }
 0x9c6   :  { %v2770_v7 = vpop.eup %2769 }
 0x9c7   :  { %v2410_v29 = vmul.f32 %v2770_v7, %v2407_v32  ;;  %vm2416_vm4 = vweird.f32 %v2770_v7 }
 0x9c8   :  { %vm2417_vm15 = vmor %vm2415_vm12, %vm2416_vm4 }
 0x9c9   :  { %v2411_v54 = vmul.f32 %v2770_v7, %v2410_v29 }
 0x9cb   :  { %v2412_v31 = vmul.f32 0.5, %v2411_v54 }
 0x9cd   :  { %v2413_v19 = vsub.f32 1.5, %v2412_v31 }
 0x9cf   :  { %v2414_v37 = vmul.f32 %v2770_v7, %v2413_v19 }
 0x9d1   :  { %v2418_v15 = vsel %vm2417_vm15, %v2770_v7, %v2414_v37 }
 0x9d2   :  { %v2446_v44 = vmul.f32 %v2418_v15, %v2360_v57 }
 0x9d4   :  { %v2457_v43 = vmul.f32 %v2669_v55, %v2446_v44 }
 0x9d6   :  { %v2468_v22 = vadd.f32 %v2670_v24, %v2457_v43 }
 0x9d8   :  { %2499 = vst.msk [vmem:[#allocation11 - $0x7] sm:$0x80] %vm2333_vm6, %v2468_v22 }
 0x9ed   :  { %v2404_v59 = vpop.xlane.xlu0 %2403 }
 0x9ee   :  { %v2406_v11 = vmul.f32 %v2404_v59, %v4082_v51 }
 0x9f0   :  { %v2408_v42 = vadd.f32 1e-05, %v2406_v11 }
 0x9f2   :  { %2771 = vrsqrt.f32 %v2408_v42  ;;  %vm2425_vm14 = vweird.f32 %v2408_v42 }
 0x9f8   :  { %v2772_v58 = vpop.eup %2771 }
 0x9f9   :  { %v2420_v39 = vmul.f32 %v2772_v58, %v2408_v42  ;;  %vm2426_vm13 = vweird.f32 %v2772_v58 }
 0x9fa   :  { %vm2427_vm1 = vmor %vm2425_vm14, %vm2426_vm13 }
 0x9fb   :  { %v2421_v18 = vmul.f32 %v2772_v58, %v2420_v39 }
 0x9fd   :  { %v2422_v63 = vmul.f32 0.5, %v2421_v18 }
 0x9ff   :  { %v2423_v1 = vsub.f32 1.5, %v2422_v63 }
 0xa01   :  { %v2424_v57 = vmul.f32 %v2772_v58, %v2423_v1 }
 0xa03   :  { %v2428_v27 = vsel %vm2427_vm1, %v2772_v58, %v2424_v57 }
 0xa04   :  { %v2431_v47 = vrot.slane %v2428_v27, 1  ;;  %v2432_v56 = vrot.slane %v2428_v27, 2  ;;  %v2433_v62 = vrot.slane %v2428_v27, 3  ;;  %v2434_v0 = vrot.slane %v2428_v27, 4 }
 0xa05   :  { %v2435_v21 = vrot.slane %v2428_v27, 5  ;;  %v2436_v5 = vrot.slane %v2428_v27, 6  ;;  %v2437_v25 = vrot.slane %v2428_v27, 7 }
 0xa06   :  { %v2447_v51 = vmul.f32 %v2431_v47, %v3971_v34  ;;  %v2448_v41 = vmul.f32 %v2432_v56, %v3973_v26  ;;  %v2449_v6 = vmul.f32 %v2433_v62, %v3975_v60  ;;  %v2450_v46 = vmul.f32 %v2434_v0, %v3977_v30 }
 0xa07   :  { %v2451_v8 = vmul.f32 %v2435_v21, %v3979_v40  ;;  %v2452_v36 = vmul.f32 %v2436_v5, %v3981_v48  ;;  %v2453_v53 = vmul.f32 %v2437_v25, %v3983_v10 }
 0xa08   :  { %v2458_v17 = vmul.f32 %v2669_v55, %v2447_v51  ;;  %v2459_v4 = vmul.f32 %v2669_v55, %v2448_v41  ;;  %v2460_v50 = vmul.f32 %v2669_v55, %v2449_v6  ;;  %v2461_v52 = vmul.f32 %v2669_v55, %v2450_v46 }
 0xa09   :  { %v2462_v9 = vmul.f32 %v2669_v55, %v2451_v8  ;;  %v2463_v13 = vmul.f32 %v2669_v55, %v2452_v36  ;;  %v2464_v16 = vmul.f32 %v2669_v55, %v2453_v53 }
 0xa0a   :  { %v2469_v34 = vadd.f32 %v2670_v24, %v2458_v17  ;;  %v2470_v23 = vadd.f32 %v2670_v24, %v2459_v4  ;;  %v2471_v26 = vadd.f32 %v2670_v24, %v2460_v50  ;;  %v2472_v38 = vadd.f32 %v2670_v24, %v2461_v52 }
 0xa0b   :  { %v2473_v60 = vadd.f32 %v2670_v24, %v2462_v9  ;;  %v2474_v49 = vadd.f32 %v2670_v24, %v2463_v13  ;;  %v2475_v14 = vadd.f32 %v2670_v24, %v2464_v16 }
 0xa0c   :  { %v2484_v30 = vrot.slane %v2469_v34, 7  ;;  %v2485_v20 = vrot.slane %v2470_v23, 6  ;;  %v2487_v40 = vrot.slane %v2471_v26, 5  ;;  %v2489_v10 = vrot.slane %v2472_v38, 4 }
 0xa0d   :  { %v2491_v2 = vrot.slane %v2473_v60, 3  ;;  %v2493_v33 = vrot.slane %v2474_v49, 2  ;;  %v2495_v12 = vrot.slane %v2475_v14, 1 }
 0xa0e   :  { %v2486_v48 = vsel %vm2314_vm0, %v2485_v20, %v2484_v30 }
 0xa0f   :  { %v2488_v35 = vsel %vm2317_vm7, %v2487_v40, %v2486_v48 }
 0xa10   :  { %v2490_v28 = vsel %vm2320_vm8, %v2489_v10, %v2488_v35 }
 0xa11   :  { %v2492_v3 = vsel %vm2323_vm9, %v2491_v2, %v2490_v28 }
 0xa12   :  { %v2494_v61 = vsel %vm2326_vm10, %v2493_v33, %v2492_v3 }
 0xa13   :  { %v2496_v45 = vsel %vm2329_vm11, %v2495_v12, %v2494_v61 }
 0xa14   :  { %2500 = vst.msk [vmem:[#allocation11 + $0x1] sm:$0x7f] %vm2337_vm2, %v2496_v45 }
 0xa15   :  { %2511 = dma.vmem_to_hbm [thread:$0]  %s2507_s17, 128, %s2509_s21, [#allocation4]  }
 0xa16   :  { %2923 = dma.done.wait [#allocation4], 128  }
 0xa17   :  { %2924 = vsyncadd [#allocation4], 4294967168 }
 0xa18   :  { %2516 = vsyncpa [#allocation3], 1 }
 0xa19   :  { %2517 = vsyncpa [#allocation6], 1 }
 0xa1a   :  { %2518 = vsyncpa [#allocation9], 1 }
 0xa1b   :  { %2519 = vsyncpa [#allocation4], 1 }

</bundles_post_ra>
